<compile_context>
chip_gen: v5e
topology: v5e:2x2
jax: 0.10.0
libtpu: 0.0.40
codegen_flags: <defaults>
</compile_context>

<pallas_src>
from typing import NamedTuple, Tuple

import jax
import jax.numpy as jnp
from jax import lax
from jax.experimental import pallas as pl
from jax.experimental.pallas import tpu as pltpu


# ----------------------------------------------------------------------------
# Static layout of the packed parameter slabs.
# ----------------------------------------------------------------------------
class _Layout(NamedTuple):
    num_layers: int
    input_dims: int
    hidden_dim: int
    n_classes: int
    layers: Tuple[Tuple[int, int, int], ...]   # per layer: (d_in, w_ih_off, w_hh_off)
    fc_off: int
    w_rows: int
    cols: int


def _pad16(n: int) -> int:
    # bf16 sublane tile is (16, 128): keep every block's row offset 16-aligned.
    return -(-n // 16) * 16


def _pad_block(a, rows, cols):
    a = jnp.asarray(a, jnp.float32)
    return jnp.pad(a, ((0, rows - a.shape[0]), (0, cols - a.shape[1])))


def pack_params(params):
    """Pack all weights into one bf16 slab and all biases into one f32 slab."""
    lstm = params["lstm"]
    num_layers = len(lstm)
    H = lstm[0]["w_hh_t"].shape[0]
    D = lstm[0]["w_ih_t"].shape[0]
    C = params["w_fc_t"].shape[1]
    cols = max(4 * H, C)

    pieces, layer_meta, off = [], [], 0
    for layer in lstm:
        d_in = layer["w_ih_t"].shape[0]
        ih_off = off
        pieces.append(_pad_block(layer["w_ih_t"], _pad16(d_in), cols))
        off += _pad16(d_in)
        hh_off = off
        pieces.append(_pad_block(layer["w_hh_t"], _pad16(H), cols))
        off += _pad16(H)
        layer_meta.append((d_in, ih_off, hh_off))
    fc_off = off
    pieces.append(_pad_block(params["w_fc_t"], _pad16(H), cols))
    off += _pad16(H)

    # bf16 weights (MXU operands); biases stay f32 (added to f32 accumulators).
    w_slab = jnp.concatenate(pieces, axis=0).astype(jnp.bfloat16)
    b_rows = [_pad_block(layer["bias"], 1, cols) for layer in lstm]
    b_rows.append(_pad_block(params["b_fc"], 1, cols))
    b_slab = jnp.concatenate(b_rows, axis=0).astype(jnp.float32)

    layout = _Layout(num_layers, D, H, C, tuple(layer_meta), fc_off, off, cols)
    return w_slab, b_slab, layout


# ----------------------------------------------------------------------------
# Fused kernel: stacked LSTM layers + ReLU + FC, everything VMEM-resident.
# Ref order: x, w_slab (bf16), b_slab (f32), out, h_scratch.
# ----------------------------------------------------------------------------
def _make_fused_lstm_kernel(layout: _Layout):
    L = layout.num_layers
    H = layout.hidden_dim
    C = layout.n_classes
    G = 4 * H

    def kernel(x_ref, w_ref, b_ref, out_ref, h_scr):
        B, T, _ = x_ref.shape
        TB = T * B

        # --- one-time batch-first -> time-major permute of the narrow input ---
        # (row index becomes t*B + b, so per-step gate slices are contiguous)
        x_f32 = x_ref[...].astype(jnp.float32)                       # (B, T, D)
        cur = jnp.concatenate([x_f32[:, t, :] for t in range(T)], axis=0)  # (TB, D)

        for l, (d_in, ih_off, hh_off) in enumerate(layout.layers):
            w_ih = w_ref[ih_off:ih_off + d_in, 0:G]     # (d_in, 4H) bf16
            w_hh = w_ref[hh_off:hh_off + H, 0:G]        # (H,    4H) bf16
            bias = b_ref[l:l + 1, 0:G]                  # (1,    4H) f32

            # --- hoisted input projection: one MXU matmul for all timesteps ---
            pre = jnp.dot(cur.astype(jnp.bfloat16), w_ih,
                          preferred_element_type=jnp.float32) + bias   # (TB, 4H) f32

            # --- serial recurrence (statically unrolled; T is tiny) -----------
            h = jnp.zeros((B, H), jnp.float32)
            c = jnp.zeros((B, H), jnp.float32)
            for t in range(T):
                g = pre[t * B:(t + 1) * B, :] + jnp.dot(
                    h.astype(jnp.bfloat16), w_hh,
                    preferred_element_type=jnp.float32)                # (B, 4H) f32
                sg = jax.nn.sigmoid(g)           # one EUP pass covers i, f, o
                i_g = sg[:, 0 * H:1 * H]
                f_g = sg[:, 1 * H:2 * H]
                o_g = sg[:, 3 * H:4 * H]
                g_g = jnp.tanh(g[:, 2 * H:3 * H])
                c = f_g * c + i_g * g_g
                h = o_g * jnp.tanh(c)
                h_scr[t * B:(t + 1) * B, :] = h  # dense time-major h slab (f32)
            cur = h_scr[...]                     # (TB, H) f32, row = t*B + b

        # --- epilogue: ReLU + FC over all timesteps in one batched matmul -----
        w_fc = w_ref[layout.fc_off:layout.fc_off + H, 0:C]             # (H, C) bf16
        b_fc = b_ref[L:L + 1, 0:C]                                     # (1, C) f32
        logits = jnp.dot(jnp.maximum(cur, 0.0).astype(jnp.bfloat16), w_fc,
                         preferred_element_type=jnp.float32) + b_fc    # (TB, C) f32

        # One-time time-major -> batch-first repack of the tiny logits; single
        # dense (B, T, C) output write.
        out_btc = jnp.concatenate(
            [logits[t * B:(t + 1) * B, :][:, None, :] for t in range(T)], axis=1)
        out_ref[...] = out_btc.astype(out_ref.dtype)

    return kernel


# ----------------------------------------------------------------------------
# Wrapper: single pallas_call, no grid, 3 VMEM inputs (x + 2 packed slabs).
# ----------------------------------------------------------------------------
def make_lstm_forward(layout: _Layout):
    kernel = _make_fused_lstm_kernel(layout)

    @jax.jit
    def forward(x_btd, w_slab, b_slab):
        B, T, _ = x_btd.shape
        vmem = pl.BlockSpec(memory_space=pltpu.MemorySpace.VMEM)
        return pl.pallas_call(
            kernel,
            out_shape=jax.ShapeDtypeStruct((B, T, layout.n_classes), jnp.float32),
            in_specs=[vmem, vmem, vmem],
            out_specs=vmem,
            scratch_shapes=[pltpu.VMEM((T * B, layout.hidden_dim), jnp.float32)],
            # ~50 KB resident footprint; 16 MiB limit is generous on every
            # generation (re-derive if B/T/H scale; v7x has 64 MiB physical VMEM).
            compiler_params=pltpu.CompilerParams(
                vmem_limit_bytes=16 * 1024 * 1024),
        )(x_btd, w_slab, b_slab)

    return forward


# ----------------------------------------------------------------------------
# Pure-JAX reference (lax.scan) for validation. matmul_dtype=jnp.bfloat16 gives a
# reference matched to the kernel's reduced-precision matmul operands.
# ----------------------------------------------------------------------------
def reference_forward(x_btd, params, matmul_dtype=jnp.float32):
    def mm(a, b):
        return jnp.dot(a.astype(matmul_dtype), b.astype(matmul_dtype),
                       preferred_element_type=jnp.float32)

    x = jnp.transpose(x_btd, (1, 0, 2)).astype(jnp.float32)      # (T, B, D)
    B = x.shape[1]
    for layer in params["lstm"]:
        H = layer["w_hh_t"].shape[0]

        def step(carry, x_t, layer=layer, H=H):
            h, c = carry
            gates = (mm(x_t, layer["w_ih_t"]) + layer["bias"][0]
                     + mm(h, layer["w_hh_t"]))
            i = jax.nn.sigmoid(gates[:, 0 * H:1 * H])
            f = jax.nn.sigmoid(gates[:, 1 * H:2 * H])
            g = jnp.tanh(gates[:, 2 * H:3 * H])
            o = jax.nn.sigmoid(gates[:, 3 * H:4 * H])
            c = f * c + i * g
            h = o * jnp.tanh(c)
            return (h, c), h

        init = (jnp.zeros((B, H), jnp.float32), jnp.zeros((B, H), jnp.float32))
        _, x = lax.scan(step, init, x)
    out = mm(jnp.maximum(x, 0.0), params["w_fc_t"]) + params["b_fc"][0]
    return jnp.transpose(out, (1, 0, 2))


# ----------------------------------------------------------------------------
# Deterministic parameter init (PyTorch shapes: W_ih (4H, D), W_hh (4H, H),
# b_ih/b_hh (4H,), fc weight (C, H), fc bias (C,); uniform(-1/sqrt(H), 1/sqrt(H))).
# Weights are stored pre-transposed; biases pre-summed (b_ih + b_hh).
# ----------------------------------------------------------------------------
def init_params(key, input_dims, hidden_dim, num_layers, n_classes):
    k = 1.0 / jnp.sqrt(hidden_dim)
    params = {"lstm": []}
    for layer in range(num_layers):
        d_in = input_dims if layer == 0 else hidden_dim
        key, k1, k2, k3, k4 = jax.random.split(key, 5)
        w_ih = jax.random.uniform(k1, (4 * hidden_dim, d_in), jnp.float32, -k, k)
        w_hh = jax.random.uniform(k2, (4 * hidden_dim, hidden_dim), jnp.float32, -k, k)
        b_ih = jax.random.uniform(k3, (4 * hidden_dim,), jnp.float32, -k, k)
        b_hh = jax.random.uniform(k4, (4 * hidden_dim,), jnp.float32, -k, k)
        params["lstm"].append({
            "w_ih_t": w_ih.T,                         # (D_in, 4H)
            "w_hh_t": w_hh.T,                         # (H, 4H)
            "bias": (b_ih + b_hh)[None, :],           # (1, 4H)
        })
    key, k5, k6 = jax.random.split(key, 3)
    kf = 1.0 / jnp.sqrt(hidden_dim)
    w_fc = jax.random.uniform(k5, (n_classes, hidden_dim), jnp.float32, -kf, kf)
    b_fc = jax.random.uniform(k6, (n_classes,), jnp.float32, -kf, kf)
    params["w_fc_t"] = w_fc.T                         # (H, C)
    params["b_fc"] = b_fc[None, :]                    # (1, C)
    return params


if __name__ == "__main__":
    # small config consistent with the module's forward
    B, T, D = 2, 8, 16          # batch, seq len, input_dims
    H = 32                      # hidden_dim
    NUM_LAYERS = 2              # num_layers
    C = 8                       # n_classes

    key = jax.random.PRNGKey(0)
    key, kx = jax.random.split(key)
    x = jax.random.normal(kx, (B, T, D), jnp.float32)   # batch_first input

    params = init_params(key, D, H, NUM_LAYERS, C)
    w_slab, b_slab, layout = pack_params(params)
    forward = make_lstm_forward(layout)

    out = jax.block_until_ready(forward(x, w_slab, b_slab))
    assert out.shape == (B, T, C), out.shape

    # Matched reduced-precision reference (bf16 matmul operands, f32 elsewhere).
    ref_bf16 = reference_forward(x, params, matmul_dtype=jnp.bfloat16)
    assert jnp.allclose(out, ref_bf16, atol=1e-3, rtol=1e-3), (
        float(jnp.max(jnp.abs(out - ref_bf16))))

    # Sanity check against the full-f32 reference (loose tolerance: bf16 matmuls).
    ref_f32 = reference_forward(x, params, matmul_dtype=jnp.float32)
    assert jnp.allclose(out, ref_f32, atol=5e-2, rtol=5e-2), (
        float(jnp.max(jnp.abs(out - ref_f32))))

    print("KERNEL_OK")
</pallas_src>

<mosaic_0001>
module attributes {stable_mosaic.version = 11 : i64} {
  func.func @kernel(%arg0: memref<2x8x16xf32, #tpu.memory_space<vmem>>, %arg1: memref<144x128xbf16, #tpu.memory_space<vmem>>, %arg2: memref<3x128xf32, #tpu.memory_space<vmem>>, %arg3: memref<2x8x8xf32, #tpu.memory_space<vmem>>, %arg4: memref<16x32xf32, #tpu.memory_space<vmem>>) attributes {dimension_semantics = [], scalar_prefetch = 0 : i64, scratch_operands = 1 : i64, tpu.core_type = #tpu.core_type<tc>} {
    %c0 = arith.constant 0 : index
    %c0_0 = arith.constant 0 : index
    %c0_1 = arith.constant 0 : index
    %0 = vector.load %arg0[%c0, %c0_0, %c0_1] : memref<2x8x16xf32, #tpu.memory_space<vmem>>, vector<2x8x16xf32>
    %1 = vector.extract_strided_slice %0 {offsets = [0, 0, 0], sizes = [2, 1, 16], strides = [1, 1, 1]} : vector<2x8x16xf32> to vector<2x1x16xf32>
    %2 = vector.shape_cast %1 : vector<2x1x16xf32> to vector<2x16xf32>
    %3 = vector.extract_strided_slice %0 {offsets = [0, 1, 0], sizes = [2, 1, 16], strides = [1, 1, 1]} : vector<2x8x16xf32> to vector<2x1x16xf32>
    %4 = vector.shape_cast %3 : vector<2x1x16xf32> to vector<2x16xf32>
    %5 = vector.extract_strided_slice %0 {offsets = [0, 2, 0], sizes = [2, 1, 16], strides = [1, 1, 1]} : vector<2x8x16xf32> to vector<2x1x16xf32>
    %6 = vector.shape_cast %5 : vector<2x1x16xf32> to vector<2x16xf32>
    %7 = vector.extract_strided_slice %0 {offsets = [0, 3, 0], sizes = [2, 1, 16], strides = [1, 1, 1]} : vector<2x8x16xf32> to vector<2x1x16xf32>
    %8 = vector.shape_cast %7 : vector<2x1x16xf32> to vector<2x16xf32>
    %9 = vector.extract_strided_slice %0 {offsets = [0, 4, 0], sizes = [2, 1, 16], strides = [1, 1, 1]} : vector<2x8x16xf32> to vector<2x1x16xf32>
    %10 = vector.shape_cast %9 : vector<2x1x16xf32> to vector<2x16xf32>
    %11 = vector.extract_strided_slice %0 {offsets = [0, 5, 0], sizes = [2, 1, 16], strides = [1, 1, 1]} : vector<2x8x16xf32> to vector<2x1x16xf32>
    %12 = vector.shape_cast %11 : vector<2x1x16xf32> to vector<2x16xf32>
    %13 = vector.extract_strided_slice %0 {offsets = [0, 6, 0], sizes = [2, 1, 16], strides = [1, 1, 1]} : vector<2x8x16xf32> to vector<2x1x16xf32>
    %14 = vector.shape_cast %13 : vector<2x1x16xf32> to vector<2x16xf32>
    %15 = vector.extract_strided_slice %0 {offsets = [0, 7, 0], sizes = [2, 1, 16], strides = [1, 1, 1]} : vector<2x8x16xf32> to vector<2x1x16xf32>
    %16 = vector.shape_cast %15 : vector<2x1x16xf32> to vector<2x16xf32>
    %17 = tpu.concatenate %2, %4, %6, %8, %10, %12, %14, %16 in 0 : vector<2x16xf32>, vector<2x16xf32>, vector<2x16xf32>, vector<2x16xf32>, vector<2x16xf32>, vector<2x16xf32>, vector<2x16xf32>, vector<2x16xf32> -> vector<16x16xf32>
    %c0_2 = arith.constant 0 : index
    %c0_3 = arith.constant 0 : index
    %18 = vector.load %arg1[%c0_2, %c0_3] : memref<144x128xbf16, #tpu.memory_space<vmem>>, vector<16x128xbf16>
    %c16 = arith.constant 16 : index
    %c0_4 = arith.constant 0 : index
    %19 = vector.load %arg1[%c16, %c0_4] : memref<144x128xbf16, #tpu.memory_space<vmem>>, vector<32x128xbf16>
    %c0_5 = arith.constant 0 : index
    %c0_6 = arith.constant 0 : index
    %20 = vector.load %arg2[%c0_5, %c0_6] : memref<3x128xf32, #tpu.memory_space<vmem>>, vector<1x128xf32>
    %21 = arith.truncf %17 : vector<16x16xf32> to vector<16x16xbf16>
    %cst = arith.constant dense<0.000000e+00> : vector<16x128xf32>
    %22 = tpu.matmul %21, %18, %cst {dimension_numbers = #tpu.dot_dimension_numbers<[1], [0], [0], [1], [0, 0, 1, 1], [], []>} : vector<16x16xbf16>, vector<16x128xbf16>, vector<16x128xf32> -> vector<16x128xf32>
    %23 = vector.broadcast %20 : vector<1x128xf32> to vector<16x128xf32>
    %24 = arith.addf %22, %23 : vector<16x128xf32>
    %cst_7 = arith.constant 0.000000e+00 : f32
    %25 = vector.broadcast %cst_7 : f32 to vector<2x32xf32>
    %cst_8 = arith.constant 0.000000e+00 : f32
    %26 = vector.broadcast %cst_8 : f32 to vector<2x32xf32>
    %27 = vector.extract_strided_slice %24 {offsets = [0, 0], sizes = [2, 128], strides = [1, 1]} : vector<16x128xf32> to vector<2x128xf32>
    %28 = arith.truncf %25 : vector<2x32xf32> to vector<2x32xbf16>
    %cst_9 = arith.constant dense<0.000000e+00> : vector<2x128xf32>
    %29 = tpu.matmul %28, %19, %cst_9 {dimension_numbers = #tpu.dot_dimension_numbers<[1], [0], [0], [1], [0, 0, 1, 1], [], []>} : vector<2x32xbf16>, vector<32x128xbf16>, vector<2x128xf32> -> vector<2x128xf32>
    %30 = arith.addf %27, %29 : vector<2x128xf32>
    %31 = arith.negf %30 : vector<2x128xf32>
    %32 = math.exp %31 : vector<2x128xf32>
    %cst_10 = arith.constant 1.000000e+00 : f32
    %33 = vector.broadcast %cst_10 : f32 to vector<2x128xf32>
    %34 = arith.addf %33, %32 : vector<2x128xf32>
    %35 = arith.divf %33, %34 : vector<2x128xf32>
    %36 = vector.extract_strided_slice %35 {offsets = [0, 0], sizes = [2, 32], strides = [1, 1]} : vector<2x128xf32> to vector<2x32xf32>
    %37 = vector.extract_strided_slice %35 {offsets = [0, 32], sizes = [2, 32], strides = [1, 1]} : vector<2x128xf32> to vector<2x32xf32>
    %38 = vector.extract_strided_slice %35 {offsets = [0, 96], sizes = [2, 32], strides = [1, 1]} : vector<2x128xf32> to vector<2x32xf32>
    %39 = vector.extract_strided_slice %30 {offsets = [0, 64], sizes = [2, 32], strides = [1, 1]} : vector<2x128xf32> to vector<2x32xf32>
    %40 = math.tanh %39 : vector<2x32xf32>
    %41 = arith.mulf %37, %26 : vector<2x32xf32>
    %42 = arith.mulf %36, %40 : vector<2x32xf32>
    %43 = arith.addf %41, %42 : vector<2x32xf32>
    %44 = math.tanh %43 : vector<2x32xf32>
    %45 = arith.mulf %38, %44 : vector<2x32xf32>
    %c0_11 = arith.constant 0 : index
    %c0_12 = arith.constant 0 : index
    %46 = vector.load %arg4[%c0_11, %c0_12] : memref<16x32xf32, #tpu.memory_space<vmem>>, vector<2x32xf32>
    tpu.vector_store %arg4[%c0_11, %c0_12], %45 {strides = array<i32>} : memref<16x32xf32, #tpu.memory_space<vmem>>, vector<2x32xf32>,
    %47 = vector.extract_strided_slice %24 {offsets = [2, 0], sizes = [2, 128], strides = [1, 1]} : vector<16x128xf32> to vector<2x128xf32>
    %48 = arith.truncf %45 : vector<2x32xf32> to vector<2x32xbf16>
    %cst_13 = arith.constant dense<0.000000e+00> : vector<2x128xf32>
    %49 = tpu.matmul %48, %19, %cst_13 {dimension_numbers = #tpu.dot_dimension_numbers<[1], [0], [0], [1], [0, 0, 1, 1], [], []>} : vector<2x32xbf16>, vector<32x128xbf16>, vector<2x128xf32> -> vector<2x128xf32>
    %50 = arith.addf %47, %49 : vector<2x128xf32>
    %51 = arith.negf %50 : vector<2x128xf32>
    %52 = math.exp %51 : vector<2x128xf32>
    %cst_14 = arith.constant 1.000000e+00 : f32
    %53 = vector.broadcast %cst_14 : f32 to vector<2x128xf32>
    %54 = arith.addf %53, %52 : vector<2x128xf32>
    %55 = arith.divf %53, %54 : vector<2x128xf32>
    %56 = vector.extract_strided_slice %55 {offsets = [0, 0], sizes = [2, 32], strides = [1, 1]} : vector<2x128xf32> to vector<2x32xf32>
    %57 = vector.extract_strided_slice %55 {offsets = [0, 32], sizes = [2, 32], strides = [1, 1]} : vector<2x128xf32> to vector<2x32xf32>
    %58 = vector.extract_strided_slice %55 {offsets = [0, 96], sizes = [2, 32], strides = [1, 1]} : vector<2x128xf32> to vector<2x32xf32>
    %59 = vector.extract_strided_slice %50 {offsets = [0, 64], sizes = [2, 32], strides = [1, 1]} : vector<2x128xf32> to vector<2x32xf32>
    %60 = math.tanh %59 : vector<2x32xf32>
    %61 = arith.mulf %57, %43 : vector<2x32xf32>
    %62 = arith.mulf %56, %60 : vector<2x32xf32>
    %63 = arith.addf %61, %62 : vector<2x32xf32>
    %64 = math.tanh %63 : vector<2x32xf32>
    %65 = arith.mulf %58, %64 : vector<2x32xf32>
    %c2 = arith.constant 2 : index
    %c0_15 = arith.constant 0 : index
    %66 = vector.load %arg4[%c2, %c0_15] : memref<16x32xf32, #tpu.memory_space<vmem>>, vector<2x32xf32>
    tpu.vector_store %arg4[%c2, %c0_15], %65 {strides = array<i32>} : memref<16x32xf32, #tpu.memory_space<vmem>>, vector<2x32xf32>,
    %67 = vector.extract_strided_slice %24 {offsets = [4, 0], sizes = [2, 128], strides = [1, 1]} : vector<16x128xf32> to vector<2x128xf32>
    %68 = arith.truncf %65 : vector<2x32xf32> to vector<2x32xbf16>
    %cst_16 = arith.constant dense<0.000000e+00> : vector<2x128xf32>
    %69 = tpu.matmul %68, %19, %cst_16 {dimension_numbers = #tpu.dot_dimension_numbers<[1], [0], [0], [1], [0, 0, 1, 1], [], []>} : vector<2x32xbf16>, vector<32x128xbf16>, vector<2x128xf32> -> vector<2x128xf32>
    %70 = arith.addf %67, %69 : vector<2x128xf32>
    %71 = arith.negf %70 : vector<2x128xf32>
    %72 = math.exp %71 : vector<2x128xf32>
    %cst_17 = arith.constant 1.000000e+00 : f32
    %73 = vector.broadcast %cst_17 : f32 to vector<2x128xf32>
    %74 = arith.addf %73, %72 : vector<2x128xf32>
    %75 = arith.divf %73, %74 : vector<2x128xf32>
    %76 = vector.extract_strided_slice %75 {offsets = [0, 0], sizes = [2, 32], strides = [1, 1]} : vector<2x128xf32> to vector<2x32xf32>
    %77 = vector.extract_strided_slice %75 {offsets = [0, 32], sizes = [2, 32], strides = [1, 1]} : vector<2x128xf32> to vector<2x32xf32>
    %78 = vector.extract_strided_slice %75 {offsets = [0, 96], sizes = [2, 32], strides = [1, 1]} : vector<2x128xf32> to vector<2x32xf32>
    %79 = vector.extract_strided_slice %70 {offsets = [0, 64], sizes = [2, 32], strides = [1, 1]} : vector<2x128xf32> to vector<2x32xf32>
    %80 = math.tanh %79 : vector<2x32xf32>
    %81 = arith.mulf %77, %63 : vector<2x32xf32>
    %82 = arith.mulf %76, %80 : vector<2x32xf32>
    %83 = arith.addf %81, %82 : vector<2x32xf32>
    %84 = math.tanh %83 : vector<2x32xf32>
    %85 = arith.mulf %78, %84 : vector<2x32xf32>
    %c4 = arith.constant 4 : index
    %c0_18 = arith.constant 0 : index
    %86 = vector.load %arg4[%c4, %c0_18] : memref<16x32xf32, #tpu.memory_space<vmem>>, vector<2x32xf32>
    tpu.vector_store %arg4[%c4, %c0_18], %85 {strides = array<i32>} : memref<16x32xf32, #tpu.memory_space<vmem>>, vector<2x32xf32>,
    %87 = vector.extract_strided_slice %24 {offsets = [6, 0], sizes = [2, 128], strides = [1, 1]} : vector<16x128xf32> to vector<2x128xf32>
    %88 = arith.truncf %85 : vector<2x32xf32> to vector<2x32xbf16>
    %cst_19 = arith.constant dense<0.000000e+00> : vector<2x128xf32>
    %89 = tpu.matmul %88, %19, %cst_19 {dimension_numbers = #tpu.dot_dimension_numbers<[1], [0], [0], [1], [0, 0, 1, 1], [], []>} : vector<2x32xbf16>, vector<32x128xbf16>, vector<2x128xf32> -> vector<2x128xf32>
    %90 = arith.addf %87, %89 : vector<2x128xf32>
    %91 = arith.negf %90 : vector<2x128xf32>
    %92 = math.exp %91 : vector<2x128xf32>
    %cst_20 = arith.constant 1.000000e+00 : f32
    %93 = vector.broadcast %cst_20 : f32 to vector<2x128xf32>
    %94 = arith.addf %93, %92 : vector<2x128xf32>
    %95 = arith.divf %93, %94 : vector<2x128xf32>
    %96 = vector.extract_strided_slice %95 {offsets = [0, 0], sizes = [2, 32], strides = [1, 1]} : vector<2x128xf32> to vector<2x32xf32>
    %97 = vector.extract_strided_slice %95 {offsets = [0, 32], sizes = [2, 32], strides = [1, 1]} : vector<2x128xf32> to vector<2x32xf32>
    %98 = vector.extract_strided_slice %95 {offsets = [0, 96], sizes = [2, 32], strides = [1, 1]} : vector<2x128xf32> to vector<2x32xf32>
    %99 = vector.extract_strided_slice %90 {offsets = [0, 64], sizes = [2, 32], strides = [1, 1]} : vector<2x128xf32> to vector<2x32xf32>
    %100 = math.tanh %99 : vector<2x32xf32>
    %101 = arith.mulf %97, %83 : vector<2x32xf32>
    %102 = arith.mulf %96, %100 : vector<2x32xf32>
    %103 = arith.addf %101, %102 : vector<2x32xf32>
    %104 = math.tanh %103 : vector<2x32xf32>
    %105 = arith.mulf %98, %104 : vector<2x32xf32>
    %c6 = arith.constant 6 : index
    %c0_21 = arith.constant 0 : index
    %106 = vector.load %arg4[%c6, %c0_21] : memref<16x32xf32, #tpu.memory_space<vmem>>, vector<2x32xf32>
    tpu.vector_store %arg4[%c6, %c0_21], %105 {strides = array<i32>} : memref<16x32xf32, #tpu.memory_space<vmem>>, vector<2x32xf32>,
    %107 = vector.extract_strided_slice %24 {offsets = [8, 0], sizes = [2, 128], strides = [1, 1]} : vector<16x128xf32> to vector<2x128xf32>
    %108 = arith.truncf %105 : vector<2x32xf32> to vector<2x32xbf16>
    %cst_22 = arith.constant dense<0.000000e+00> : vector<2x128xf32>
    %109 = tpu.matmul %108, %19, %cst_22 {dimension_numbers = #tpu.dot_dimension_numbers<[1], [0], [0], [1], [0, 0, 1, 1], [], []>} : vector<2x32xbf16>, vector<32x128xbf16>, vector<2x128xf32> -> vector<2x128xf32>
    %110 = arith.addf %107, %109 : vector<2x128xf32>
    %111 = arith.negf %110 : vector<2x128xf32>
    %112 = math.exp %111 : vector<2x128xf32>
    %cst_23 = arith.constant 1.000000e+00 : f32
    %113 = vector.broadcast %cst_23 : f32 to vector<2x128xf32>
    %114 = arith.addf %113, %112 : vector<2x128xf32>
    %115 = arith.divf %113, %114 : vector<2x128xf32>
    %116 = vector.extract_strided_slice %115 {offsets = [0, 0], sizes = [2, 32], strides = [1, 1]} : vector<2x128xf32> to vector<2x32xf32>
    %117 = vector.extract_strided_slice %115 {offsets = [0, 32], sizes = [2, 32], strides = [1, 1]} : vector<2x128xf32> to vector<2x32xf32>
    %118 = vector.extract_strided_slice %115 {offsets = [0, 96], sizes = [2, 32], strides = [1, 1]} : vector<2x128xf32> to vector<2x32xf32>
    %119 = vector.extract_strided_slice %110 {offsets = [0, 64], sizes = [2, 32], strides = [1, 1]} : vector<2x128xf32> to vector<2x32xf32>
    %120 = math.tanh %119 : vector<2x32xf32>
    %121 = arith.mulf %117, %103 : vector<2x32xf32>
    %122 = arith.mulf %116, %120 : vector<2x32xf32>
    %123 = arith.addf %121, %122 : vector<2x32xf32>
    %124 = math.tanh %123 : vector<2x32xf32>
    %125 = arith.mulf %118, %124 : vector<2x32xf32>
    %c8 = arith.constant 8 : index
    %c0_24 = arith.constant 0 : index
    %126 = vector.load %arg4[%c8, %c0_24] : memref<16x32xf32, #tpu.memory_space<vmem>>, vector<2x32xf32>
    tpu.vector_store %arg4[%c8, %c0_24], %125 {strides = array<i32>} : memref<16x32xf32, #tpu.memory_space<vmem>>, vector<2x32xf32>,
    %127 = vector.extract_strided_slice %24 {offsets = [10, 0], sizes = [2, 128], strides = [1, 1]} : vector<16x128xf32> to vector<2x128xf32>
    %128 = arith.truncf %125 : vector<2x32xf32> to vector<2x32xbf16>
    %cst_25 = arith.constant dense<0.000000e+00> : vector<2x128xf32>
    %129 = tpu.matmul %128, %19, %cst_25 {dimension_numbers = #tpu.dot_dimension_numbers<[1], [0], [0], [1], [0, 0, 1, 1], [], []>} : vector<2x32xbf16>, vector<32x128xbf16>, vector<2x128xf32> -> vector<2x128xf32>
    %130 = arith.addf %127, %129 : vector<2x128xf32>
    %131 = arith.negf %130 : vector<2x128xf32>
    %132 = math.exp %131 : vector<2x128xf32>
    %cst_26 = arith.constant 1.000000e+00 : f32
    %133 = vector.broadcast %cst_26 : f32 to vector<2x128xf32>
    %134 = arith.addf %133, %132 : vector<2x128xf32>
    %135 = arith.divf %133, %134 : vector<2x128xf32>
    %136 = vector.extract_strided_slice %135 {offsets = [0, 0], sizes = [2, 32], strides = [1, 1]} : vector<2x128xf32> to vector<2x32xf32>
    %137 = vector.extract_strided_slice %135 {offsets = [0, 32], sizes = [2, 32], strides = [1, 1]} : vector<2x128xf32> to vector<2x32xf32>
    %138 = vector.extract_strided_slice %135 {offsets = [0, 96], sizes = [2, 32], strides = [1, 1]} : vector<2x128xf32> to vector<2x32xf32>
    %139 = vector.extract_strided_slice %130 {offsets = [0, 64], sizes = [2, 32], strides = [1, 1]} : vector<2x128xf32> to vector<2x32xf32>
    %140 = math.tanh %139 : vector<2x32xf32>
    %141 = arith.mulf %137, %123 : vector<2x32xf32>
    %142 = arith.mulf %136, %140 : vector<2x32xf32>
    %143 = arith.addf %141, %142 : vector<2x32xf32>
    %144 = math.tanh %143 : vector<2x32xf32>
    %145 = arith.mulf %138, %144 : vector<2x32xf32>
    %c10 = arith.constant 10 : index
    %c0_27 = arith.constant 0 : index
    %146 = vector.load %arg4[%c10, %c0_27] : memref<16x32xf32, #tpu.memory_space<vmem>>, vector<2x32xf32>
    tpu.vector_store %arg4[%c10, %c0_27], %145 {strides = array<i32>} : memref<16x32xf32, #tpu.memory_space<vmem>>, vector<2x32xf32>,
    %147 = vector.extract_strided_slice %24 {offsets = [12, 0], sizes = [2, 128], strides = [1, 1]} : vector<16x128xf32> to vector<2x128xf32>
    %148 = arith.truncf %145 : vector<2x32xf32> to vector<2x32xbf16>
    %cst_28 = arith.constant dense<0.000000e+00> : vector<2x128xf32>
    %149 = tpu.matmul %148, %19, %cst_28 {dimension_numbers = #tpu.dot_dimension_numbers<[1], [0], [0], [1], [0, 0, 1, 1], [], []>} : vector<2x32xbf16>, vector<32x128xbf16>, vector<2x128xf32> -> vector<2x128xf32>
    %150 = arith.addf %147, %149 : vector<2x128xf32>
    %151 = arith.negf %150 : vector<2x128xf32>
    %152 = math.exp %151 : vector<2x128xf32>
    %cst_29 = arith.constant 1.000000e+00 : f32
    %153 = vector.broadcast %cst_29 : f32 to vector<2x128xf32>
    %154 = arith.addf %153, %152 : vector<2x128xf32>
    %155 = arith.divf %153, %154 : vector<2x128xf32>
    %156 = vector.extract_strided_slice %155 {offsets = [0, 0], sizes = [2, 32], strides = [1, 1]} : vector<2x128xf32> to vector<2x32xf32>
    %157 = vector.extract_strided_slice %155 {offsets = [0, 32], sizes = [2, 32], strides = [1, 1]} : vector<2x128xf32> to vector<2x32xf32>
    %158 = vector.extract_strided_slice %155 {offsets = [0, 96], sizes = [2, 32], strides = [1, 1]} : vector<2x128xf32> to vector<2x32xf32>
    %159 = vector.extract_strided_slice %150 {offsets = [0, 64], sizes = [2, 32], strides = [1, 1]} : vector<2x128xf32> to vector<2x32xf32>
    %160 = math.tanh %159 : vector<2x32xf32>
    %161 = arith.mulf %157, %143 : vector<2x32xf32>
    %162 = arith.mulf %156, %160 : vector<2x32xf32>
    %163 = arith.addf %161, %162 : vector<2x32xf32>
    %164 = math.tanh %163 : vector<2x32xf32>
    %165 = arith.mulf %158, %164 : vector<2x32xf32>
    %c12 = arith.constant 12 : index
    %c0_30 = arith.constant 0 : index
    %166 = vector.load %arg4[%c12, %c0_30] : memref<16x32xf32, #tpu.memory_space<vmem>>, vector<2x32xf32>
    tpu.vector_store %arg4[%c12, %c0_30], %165 {strides = array<i32>} : memref<16x32xf32, #tpu.memory_space<vmem>>, vector<2x32xf32>,
    %167 = vector.extract_strided_slice %24 {offsets = [14, 0], sizes = [2, 128], strides = [1, 1]} : vector<16x128xf32> to vector<2x128xf32>
    %168 = arith.truncf %165 : vector<2x32xf32> to vector<2x32xbf16>
    %cst_31 = arith.constant dense<0.000000e+00> : vector<2x128xf32>
    %169 = tpu.matmul %168, %19, %cst_31 {dimension_numbers = #tpu.dot_dimension_numbers<[1], [0], [0], [1], [0, 0, 1, 1], [], []>} : vector<2x32xbf16>, vector<32x128xbf16>, vector<2x128xf32> -> vector<2x128xf32>
    %170 = arith.addf %167, %169 : vector<2x128xf32>
    %171 = arith.negf %170 : vector<2x128xf32>
    %172 = math.exp %171 : vector<2x128xf32>
    %cst_32 = arith.constant 1.000000e+00 : f32
    %173 = vector.broadcast %cst_32 : f32 to vector<2x128xf32>
    %174 = arith.addf %173, %172 : vector<2x128xf32>
    %175 = arith.divf %173, %174 : vector<2x128xf32>
    %176 = vector.extract_strided_slice %175 {offsets = [0, 0], sizes = [2, 32], strides = [1, 1]} : vector<2x128xf32> to vector<2x32xf32>
    %177 = vector.extract_strided_slice %175 {offsets = [0, 32], sizes = [2, 32], strides = [1, 1]} : vector<2x128xf32> to vector<2x32xf32>
    %178 = vector.extract_strided_slice %175 {offsets = [0, 96], sizes = [2, 32], strides = [1, 1]} : vector<2x128xf32> to vector<2x32xf32>
    %179 = vector.extract_strided_slice %170 {offsets = [0, 64], sizes = [2, 32], strides = [1, 1]} : vector<2x128xf32> to vector<2x32xf32>
    %180 = math.tanh %179 : vector<2x32xf32>
    %181 = arith.mulf %177, %163 : vector<2x32xf32>
    %182 = arith.mulf %176, %180 : vector<2x32xf32>
    %183 = arith.addf %181, %182 : vector<2x32xf32>
    %184 = math.tanh %183 : vector<2x32xf32>
    %185 = arith.mulf %178, %184 : vector<2x32xf32>
    %c14 = arith.constant 14 : index
    %c0_33 = arith.constant 0 : index
    %186 = vector.load %arg4[%c14, %c0_33] : memref<16x32xf32, #tpu.memory_space<vmem>>, vector<2x32xf32>
    tpu.vector_store %arg4[%c14, %c0_33], %185 {strides = array<i32>} : memref<16x32xf32, #tpu.memory_space<vmem>>, vector<2x32xf32>,
    %c0_34 = arith.constant 0 : index
    %c0_35 = arith.constant 0 : index
    %187 = vector.load %arg4[%c0_34, %c0_35] : memref<16x32xf32, #tpu.memory_space<vmem>>, vector<16x32xf32>
    %c48 = arith.constant 48 : index
    %c0_36 = arith.constant 0 : index
    %188 = vector.load %arg1[%c48, %c0_36] : memref<144x128xbf16, #tpu.memory_space<vmem>>, vector<32x128xbf16>
    %c80 = arith.constant 80 : index
    %c0_37 = arith.constant 0 : index
    %189 = vector.load %arg1[%c80, %c0_37] : memref<144x128xbf16, #tpu.memory_space<vmem>>, vector<32x128xbf16>
    %c1 = arith.constant 1 : index
    %c0_38 = arith.constant 0 : index
    %190 = vector.load %arg2[%c1, %c0_38] : memref<3x128xf32, #tpu.memory_space<vmem>>, vector<1x128xf32>
    %191 = arith.truncf %187 : vector<16x32xf32> to vector<16x32xbf16>
    %cst_39 = arith.constant dense<0.000000e+00> : vector<16x128xf32>
    %192 = tpu.matmul %191, %188, %cst_39 {dimension_numbers = #tpu.dot_dimension_numbers<[1], [0], [0], [1], [0, 0, 1, 1], [], []>} : vector<16x32xbf16>, vector<32x128xbf16>, vector<16x128xf32> -> vector<16x128xf32>
    %193 = vector.broadcast %190 : vector<1x128xf32> to vector<16x128xf32>
    %194 = arith.addf %192, %193 : vector<16x128xf32>
    %cst_40 = arith.constant 0.000000e+00 : f32
    %195 = vector.broadcast %cst_40 : f32 to vector<2x32xf32>
    %cst_41 = arith.constant 0.000000e+00 : f32
    %196 = vector.broadcast %cst_41 : f32 to vector<2x32xf32>
    %197 = vector.extract_strided_slice %194 {offsets = [0, 0], sizes = [2, 128], strides = [1, 1]} : vector<16x128xf32> to vector<2x128xf32>
    %198 = arith.truncf %195 : vector<2x32xf32> to vector<2x32xbf16>
    %cst_42 = arith.constant dense<0.000000e+00> : vector<2x128xf32>
    %199 = tpu.matmul %198, %189, %cst_42 {dimension_numbers = #tpu.dot_dimension_numbers<[1], [0], [0], [1], [0, 0, 1, 1], [], []>} : vector<2x32xbf16>, vector<32x128xbf16>, vector<2x128xf32> -> vector<2x128xf32>
    %200 = arith.addf %197, %199 : vector<2x128xf32>
    %201 = arith.negf %200 : vector<2x128xf32>
    %202 = math.exp %201 : vector<2x128xf32>
    %cst_43 = arith.constant 1.000000e+00 : f32
    %203 = vector.broadcast %cst_43 : f32 to vector<2x128xf32>
    %204 = arith.addf %203, %202 : vector<2x128xf32>
    %205 = arith.divf %203, %204 : vector<2x128xf32>
    %206 = vector.extract_strided_slice %205 {offsets = [0, 0], sizes = [2, 32], strides = [1, 1]} : vector<2x128xf32> to vector<2x32xf32>
    %207 = vector.extract_strided_slice %205 {offsets = [0, 32], sizes = [2, 32], strides = [1, 1]} : vector<2x128xf32> to vector<2x32xf32>
    %208 = vector.extract_strided_slice %205 {offsets = [0, 96], sizes = [2, 32], strides = [1, 1]} : vector<2x128xf32> to vector<2x32xf32>
    %209 = vector.extract_strided_slice %200 {offsets = [0, 64], sizes = [2, 32], strides = [1, 1]} : vector<2x128xf32> to vector<2x32xf32>
    %210 = math.tanh %209 : vector<2x32xf32>
    %211 = arith.mulf %207, %196 : vector<2x32xf32>
    %212 = arith.mulf %206, %210 : vector<2x32xf32>
    %213 = arith.addf %211, %212 : vector<2x32xf32>
    %214 = math.tanh %213 : vector<2x32xf32>
    %215 = arith.mulf %208, %214 : vector<2x32xf32>
    %c0_44 = arith.constant 0 : index
    %c0_45 = arith.constant 0 : index
    %216 = vector.load %arg4[%c0_44, %c0_45] : memref<16x32xf32, #tpu.memory_space<vmem>>, vector<2x32xf32>
    tpu.vector_store %arg4[%c0_44, %c0_45], %215 {strides = array<i32>} : memref<16x32xf32, #tpu.memory_space<vmem>>, vector<2x32xf32>,
    %217 = vector.extract_strided_slice %194 {offsets = [2, 0], sizes = [2, 128], strides = [1, 1]} : vector<16x128xf32> to vector<2x128xf32>
    %218 = arith.truncf %215 : vector<2x32xf32> to vector<2x32xbf16>
    %cst_46 = arith.constant dense<0.000000e+00> : vector<2x128xf32>
    %219 = tpu.matmul %218, %189, %cst_46 {dimension_numbers = #tpu.dot_dimension_numbers<[1], [0], [0], [1], [0, 0, 1, 1], [], []>} : vector<2x32xbf16>, vector<32x128xbf16>, vector<2x128xf32> -> vector<2x128xf32>
    %220 = arith.addf %217, %219 : vector<2x128xf32>
    %221 = arith.negf %220 : vector<2x128xf32>
    %222 = math.exp %221 : vector<2x128xf32>
    %cst_47 = arith.constant 1.000000e+00 : f32
    %223 = vector.broadcast %cst_47 : f32 to vector<2x128xf32>
    %224 = arith.addf %223, %222 : vector<2x128xf32>
    %225 = arith.divf %223, %224 : vector<2x128xf32>
    %226 = vector.extract_strided_slice %225 {offsets = [0, 0], sizes = [2, 32], strides = [1, 1]} : vector<2x128xf32> to vector<2x32xf32>
    %227 = vector.extract_strided_slice %225 {offsets = [0, 32], sizes = [2, 32], strides = [1, 1]} : vector<2x128xf32> to vector<2x32xf32>
    %228 = vector.extract_strided_slice %225 {offsets = [0, 96], sizes = [2, 32], strides = [1, 1]} : vector<2x128xf32> to vector<2x32xf32>
    %229 = vector.extract_strided_slice %220 {offsets = [0, 64], sizes = [2, 32], strides = [1, 1]} : vector<2x128xf32> to vector<2x32xf32>
    %230 = math.tanh %229 : vector<2x32xf32>
    %231 = arith.mulf %227, %213 : vector<2x32xf32>
    %232 = arith.mulf %226, %230 : vector<2x32xf32>
    %233 = arith.addf %231, %232 : vector<2x32xf32>
    %234 = math.tanh %233 : vector<2x32xf32>
    %235 = arith.mulf %228, %234 : vector<2x32xf32>
    %c2_48 = arith.constant 2 : index
    %c0_49 = arith.constant 0 : index
    %236 = vector.load %arg4[%c2_48, %c0_49] : memref<16x32xf32, #tpu.memory_space<vmem>>, vector<2x32xf32>
    tpu.vector_store %arg4[%c2_48, %c0_49], %235 {strides = array<i32>} : memref<16x32xf32, #tpu.memory_space<vmem>>, vector<2x32xf32>,
    %237 = vector.extract_strided_slice %194 {offsets = [4, 0], sizes = [2, 128], strides = [1, 1]} : vector<16x128xf32> to vector<2x128xf32>
    %238 = arith.truncf %235 : vector<2x32xf32> to vector<2x32xbf16>
    %cst_50 = arith.constant dense<0.000000e+00> : vector<2x128xf32>
    %239 = tpu.matmul %238, %189, %cst_50 {dimension_numbers = #tpu.dot_dimension_numbers<[1], [0], [0], [1], [0, 0, 1, 1], [], []>} : vector<2x32xbf16>, vector<32x128xbf16>, vector<2x128xf32> -> vector<2x128xf32>
    %240 = arith.addf %237, %239 : vector<2x128xf32>
    %241 = arith.negf %240 : vector<2x128xf32>
    %242 = math.exp %241 : vector<2x128xf32>
    %cst_51 = arith.constant 1.000000e+00 : f32
    %243 = vector.broadcast %cst_51 : f32 to vector<2x128xf32>
    %244 = arith.addf %243, %242 : vector<2x128xf32>
    %245 = arith.divf %243, %244 : vector<2x128xf32>
    %246 = vector.extract_strided_slice %245 {offsets = [0, 0], sizes = [2, 32], strides = [1, 1]} : vector<2x128xf32> to vector<2x32xf32>
    %247 = vector.extract_strided_slice %245 {offsets = [0, 32], sizes = [2, 32], strides = [1, 1]} : vector<2x128xf32> to vector<2x32xf32>
    %248 = vector.extract_strided_slice %245 {offsets = [0, 96], sizes = [2, 32], strides = [1, 1]} : vector<2x128xf32> to vector<2x32xf32>
    %249 = vector.extract_strided_slice %240 {offsets = [0, 64], sizes = [2, 32], strides = [1, 1]} : vector<2x128xf32> to vector<2x32xf32>
    %250 = math.tanh %249 : vector<2x32xf32>
    %251 = arith.mulf %247, %233 : vector<2x32xf32>
    %252 = arith.mulf %246, %250 : vector<2x32xf32>
    %253 = arith.addf %251, %252 : vector<2x32xf32>
    %254 = math.tanh %253 : vector<2x32xf32>
    %255 = arith.mulf %248, %254 : vector<2x32xf32>
    %c4_52 = arith.constant 4 : index
    %c0_53 = arith.constant 0 : index
    %256 = vector.load %arg4[%c4_52, %c0_53] : memref<16x32xf32, #tpu.memory_space<vmem>>, vector<2x32xf32>
    tpu.vector_store %arg4[%c4_52, %c0_53], %255 {strides = array<i32>} : memref<16x32xf32, #tpu.memory_space<vmem>>, vector<2x32xf32>,
    %257 = vector.extract_strided_slice %194 {offsets = [6, 0], sizes = [2, 128], strides = [1, 1]} : vector<16x128xf32> to vector<2x128xf32>
    %258 = arith.truncf %255 : vector<2x32xf32> to vector<2x32xbf16>
    %cst_54 = arith.constant dense<0.000000e+00> : vector<2x128xf32>
    %259 = tpu.matmul %258, %189, %cst_54 {dimension_numbers = #tpu.dot_dimension_numbers<[1], [0], [0], [1], [0, 0, 1, 1], [], []>} : vector<2x32xbf16>, vector<32x128xbf16>, vector<2x128xf32> -> vector<2x128xf32>
    %260 = arith.addf %257, %259 : vector<2x128xf32>
    %261 = arith.negf %260 : vector<2x128xf32>
    %262 = math.exp %261 : vector<2x128xf32>
    %cst_55 = arith.constant 1.000000e+00 : f32
    %263 = vector.broadcast %cst_55 : f32 to vector<2x128xf32>
    %264 = arith.addf %263, %262 : vector<2x128xf32>
    %265 = arith.divf %263, %264 : vector<2x128xf32>
    %266 = vector.extract_strided_slice %265 {offsets = [0, 0], sizes = [2, 32], strides = [1, 1]} : vector<2x128xf32> to vector<2x32xf32>
    %267 = vector.extract_strided_slice %265 {offsets = [0, 32], sizes = [2, 32], strides = [1, 1]} : vector<2x128xf32> to vector<2x32xf32>
    %268 = vector.extract_strided_slice %265 {offsets = [0, 96], sizes = [2, 32], strides = [1, 1]} : vector<2x128xf32> to vector<2x32xf32>
    %269 = vector.extract_strided_slice %260 {offsets = [0, 64], sizes = [2, 32], strides = [1, 1]} : vector<2x128xf32> to vector<2x32xf32>
    %270 = math.tanh %269 : vector<2x32xf32>
    %271 = arith.mulf %267, %253 : vector<2x32xf32>
    %272 = arith.mulf %266, %270 : vector<2x32xf32>
    %273 = arith.addf %271, %272 : vector<2x32xf32>
    %274 = math.tanh %273 : vector<2x32xf32>
    %275 = arith.mulf %268, %274 : vector<2x32xf32>
    %c6_56 = arith.constant 6 : index
    %c0_57 = arith.constant 0 : index
    %276 = vector.load %arg4[%c6_56, %c0_57] : memref<16x32xf32, #tpu.memory_space<vmem>>, vector<2x32xf32>
    tpu.vector_store %arg4[%c6_56, %c0_57], %275 {strides = array<i32>} : memref<16x32xf32, #tpu.memory_space<vmem>>, vector<2x32xf32>,
    %277 = vector.extract_strided_slice %194 {offsets = [8, 0], sizes = [2, 128], strides = [1, 1]} : vector<16x128xf32> to vector<2x128xf32>
    %278 = arith.truncf %275 : vector<2x32xf32> to vector<2x32xbf16>
    %cst_58 = arith.constant dense<0.000000e+00> : vector<2x128xf32>
    %279 = tpu.matmul %278, %189, %cst_58 {dimension_numbers = #tpu.dot_dimension_numbers<[1], [0], [0], [1], [0, 0, 1, 1], [], []>} : vector<2x32xbf16>, vector<32x128xbf16>, vector<2x128xf32> -> vector<2x128xf32>
    %280 = arith.addf %277, %279 : vector<2x128xf32>
    %281 = arith.negf %280 : vector<2x128xf32>
    %282 = math.exp %281 : vector<2x128xf32>
    %cst_59 = arith.constant 1.000000e+00 : f32
    %283 = vector.broadcast %cst_59 : f32 to vector<2x128xf32>
    %284 = arith.addf %283, %282 : vector<2x128xf32>
    %285 = arith.divf %283, %284 : vector<2x128xf32>
    %286 = vector.extract_strided_slice %285 {offsets = [0, 0], sizes = [2, 32], strides = [1, 1]} : vector<2x128xf32> to vector<2x32xf32>
    %287 = vector.extract_strided_slice %285 {offsets = [0, 32], sizes = [2, 32], strides = [1, 1]} : vector<2x128xf32> to vector<2x32xf32>
    %288 = vector.extract_strided_slice %285 {offsets = [0, 96], sizes = [2, 32], strides = [1, 1]} : vector<2x128xf32> to vector<2x32xf32>
    %289 = vector.extract_strided_slice %280 {offsets = [0, 64], sizes = [2, 32], strides = [1, 1]} : vector<2x128xf32> to vector<2x32xf32>
    %290 = math.tanh %289 : vector<2x32xf32>
    %291 = arith.mulf %287, %273 : vector<2x32xf32>
    %292 = arith.mulf %286, %290 : vector<2x32xf32>
    %293 = arith.addf %291, %292 : vector<2x32xf32>
    %294 = math.tanh %293 : vector<2x32xf32>
    %295 = arith.mulf %288, %294 : vector<2x32xf32>
    %c8_60 = arith.constant 8 : index
    %c0_61 = arith.constant 0 : index
    %296 = vector.load %arg4[%c8_60, %c0_61] : memref<16x32xf32, #tpu.memory_space<vmem>>, vector<2x32xf32>
    tpu.vector_store %arg4[%c8_60, %c0_61], %295 {strides = array<i32>} : memref<16x32xf32, #tpu.memory_space<vmem>>, vector<2x32xf32>,
    %297 = vector.extract_strided_slice %194 {offsets = [10, 0], sizes = [2, 128], strides = [1, 1]} : vector<16x128xf32> to vector<2x128xf32>
    %298 = arith.truncf %295 : vector<2x32xf32> to vector<2x32xbf16>
    %cst_62 = arith.constant dense<0.000000e+00> : vector<2x128xf32>
    %299 = tpu.matmul %298, %189, %cst_62 {dimension_numbers = #tpu.dot_dimension_numbers<[1], [0], [0], [1], [0, 0, 1, 1], [], []>} : vector<2x32xbf16>, vector<32x128xbf16>, vector<2x128xf32> -> vector<2x128xf32>
    %300 = arith.addf %297, %299 : vector<2x128xf32>
    %301 = arith.negf %300 : vector<2x128xf32>
    %302 = math.exp %301 : vector<2x128xf32>
    %cst_63 = arith.constant 1.000000e+00 : f32
    %303 = vector.broadcast %cst_63 : f32 to vector<2x128xf32>
    %304 = arith.addf %303, %302 : vector<2x128xf32>
    %305 = arith.divf %303, %304 : vector<2x128xf32>
    %306 = vector.extract_strided_slice %305 {offsets = [0, 0], sizes = [2, 32], strides = [1, 1]} : vector<2x128xf32> to vector<2x32xf32>
    %307 = vector.extract_strided_slice %305 {offsets = [0, 32], sizes = [2, 32], strides = [1, 1]} : vector<2x128xf32> to vector<2x32xf32>
    %308 = vector.extract_strided_slice %305 {offsets = [0, 96], sizes = [2, 32], strides = [1, 1]} : vector<2x128xf32> to vector<2x32xf32>
    %309 = vector.extract_strided_slice %300 {offsets = [0, 64], sizes = [2, 32], strides = [1, 1]} : vector<2x128xf32> to vector<2x32xf32>
    %310 = math.tanh %309 : vector<2x32xf32>
    %311 = arith.mulf %307, %293 : vector<2x32xf32>
    %312 = arith.mulf %306, %310 : vector<2x32xf32>
    %313 = arith.addf %311, %312 : vector<2x32xf32>
    %314 = math.tanh %313 : vector<2x32xf32>
    %315 = arith.mulf %308, %314 : vector<2x32xf32>
    %c10_64 = arith.constant 10 : index
    %c0_65 = arith.constant 0 : index
    %316 = vector.load %arg4[%c10_64, %c0_65] : memref<16x32xf32, #tpu.memory_space<vmem>>, vector<2x32xf32>
    tpu.vector_store %arg4[%c10_64, %c0_65], %315 {strides = array<i32>} : memref<16x32xf32, #tpu.memory_space<vmem>>, vector<2x32xf32>,
    %317 = vector.extract_strided_slice %194 {offsets = [12, 0], sizes = [2, 128], strides = [1, 1]} : vector<16x128xf32> to vector<2x128xf32>
    %318 = arith.truncf %315 : vector<2x32xf32> to vector<2x32xbf16>
    %cst_66 = arith.constant dense<0.000000e+00> : vector<2x128xf32>
    %319 = tpu.matmul %318, %189, %cst_66 {dimension_numbers = #tpu.dot_dimension_numbers<[1], [0], [0], [1], [0, 0, 1, 1], [], []>} : vector<2x32xbf16>, vector<32x128xbf16>, vector<2x128xf32> -> vector<2x128xf32>
    %320 = arith.addf %317, %319 : vector<2x128xf32>
    %321 = arith.negf %320 : vector<2x128xf32>
    %322 = math.exp %321 : vector<2x128xf32>
    %cst_67 = arith.constant 1.000000e+00 : f32
    %323 = vector.broadcast %cst_67 : f32 to vector<2x128xf32>
    %324 = arith.addf %323, %322 : vector<2x128xf32>
    %325 = arith.divf %323, %324 : vector<2x128xf32>
    %326 = vector.extract_strided_slice %325 {offsets = [0, 0], sizes = [2, 32], strides = [1, 1]} : vector<2x128xf32> to vector<2x32xf32>
    %327 = vector.extract_strided_slice %325 {offsets = [0, 32], sizes = [2, 32], strides = [1, 1]} : vector<2x128xf32> to vector<2x32xf32>
    %328 = vector.extract_strided_slice %325 {offsets = [0, 96], sizes = [2, 32], strides = [1, 1]} : vector<2x128xf32> to vector<2x32xf32>
    %329 = vector.extract_strided_slice %320 {offsets = [0, 64], sizes = [2, 32], strides = [1, 1]} : vector<2x128xf32> to vector<2x32xf32>
    %330 = math.tanh %329 : vector<2x32xf32>
    %331 = arith.mulf %327, %313 : vector<2x32xf32>
    %332 = arith.mulf %326, %330 : vector<2x32xf32>
    %333 = arith.addf %331, %332 : vector<2x32xf32>
    %334 = math.tanh %333 : vector<2x32xf32>
    %335 = arith.mulf %328, %334 : vector<2x32xf32>
    %c12_68 = arith.constant 12 : index
    %c0_69 = arith.constant 0 : index
    %336 = vector.load %arg4[%c12_68, %c0_69] : memref<16x32xf32, #tpu.memory_space<vmem>>, vector<2x32xf32>
    tpu.vector_store %arg4[%c12_68, %c0_69], %335 {strides = array<i32>} : memref<16x32xf32, #tpu.memory_space<vmem>>, vector<2x32xf32>,
    %337 = vector.extract_strided_slice %194 {offsets = [14, 0], sizes = [2, 128], strides = [1, 1]} : vector<16x128xf32> to vector<2x128xf32>
    %338 = arith.truncf %335 : vector<2x32xf32> to vector<2x32xbf16>
    %cst_70 = arith.constant dense<0.000000e+00> : vector<2x128xf32>
    %339 = tpu.matmul %338, %189, %cst_70 {dimension_numbers = #tpu.dot_dimension_numbers<[1], [0], [0], [1], [0, 0, 1, 1], [], []>} : vector<2x32xbf16>, vector<32x128xbf16>, vector<2x128xf32> -> vector<2x128xf32>
    %340 = arith.addf %337, %339 : vector<2x128xf32>
    %341 = arith.negf %340 : vector<2x128xf32>
    %342 = math.exp %341 : vector<2x128xf32>
    %cst_71 = arith.constant 1.000000e+00 : f32
    %343 = vector.broadcast %cst_71 : f32 to vector<2x128xf32>
    %344 = arith.addf %343, %342 : vector<2x128xf32>
    %345 = arith.divf %343, %344 : vector<2x128xf32>
    %346 = vector.extract_strided_slice %345 {offsets = [0, 0], sizes = [2, 32], strides = [1, 1]} : vector<2x128xf32> to vector<2x32xf32>
    %347 = vector.extract_strided_slice %345 {offsets = [0, 32], sizes = [2, 32], strides = [1, 1]} : vector<2x128xf32> to vector<2x32xf32>
    %348 = vector.extract_strided_slice %345 {offsets = [0, 96], sizes = [2, 32], strides = [1, 1]} : vector<2x128xf32> to vector<2x32xf32>
    %349 = vector.extract_strided_slice %340 {offsets = [0, 64], sizes = [2, 32], strides = [1, 1]} : vector<2x128xf32> to vector<2x32xf32>
    %350 = math.tanh %349 : vector<2x32xf32>
    %351 = arith.mulf %347, %333 : vector<2x32xf32>
    %352 = arith.mulf %346, %350 : vector<2x32xf32>
    %353 = arith.addf %351, %352 : vector<2x32xf32>
    %354 = math.tanh %353 : vector<2x32xf32>
    %355 = arith.mulf %348, %354 : vector<2x32xf32>
    %c14_72 = arith.constant 14 : index
    %c0_73 = arith.constant 0 : index
    %356 = vector.load %arg4[%c14_72, %c0_73] : memref<16x32xf32, #tpu.memory_space<vmem>>, vector<2x32xf32>
    tpu.vector_store %arg4[%c14_72, %c0_73], %355 {strides = array<i32>} : memref<16x32xf32, #tpu.memory_space<vmem>>, vector<2x32xf32>,
    %c0_74 = arith.constant 0 : index
    %c0_75 = arith.constant 0 : index
    %357 = vector.load %arg4[%c0_74, %c0_75] : memref<16x32xf32, #tpu.memory_space<vmem>>, vector<16x32xf32>
    %c112 = arith.constant 112 : index
    %c0_76 = arith.constant 0 : index
    %358 = vector.load %arg1[%c112, %c0_76] : memref<144x128xbf16, #tpu.memory_space<vmem>>, vector<32x8xbf16>
    %c2_77 = arith.constant 2 : index
    %c0_78 = arith.constant 0 : index
    %359 = vector.load %arg2[%c2_77, %c0_78] : memref<3x128xf32, #tpu.memory_space<vmem>>, vector<1x8xf32>
    %cst_79 = arith.constant 0.000000e+00 : f32
    %360 = vector.broadcast %cst_79 : f32 to vector<16x32xf32>
    %361 = arith.maximumf %357, %360 : vector<16x32xf32>
    %362 = arith.truncf %361 : vector<16x32xf32> to vector<16x32xbf16>
    %cst_80 = arith.constant dense<0.000000e+00> : vector<16x8xf32>
    %363 = tpu.matmul %362, %358, %cst_80 {dimension_numbers = #tpu.dot_dimension_numbers<[1], [0], [0], [1], [0, 0, 1, 1], [], []>} : vector<16x32xbf16>, vector<32x8xbf16>, vector<16x8xf32> -> vector<16x8xf32>
    %364 = vector.broadcast %359 : vector<1x8xf32> to vector<16x8xf32>
    %365 = arith.addf %363, %364 : vector<16x8xf32>
    %366 = vector.extract_strided_slice %365 {offsets = [0, 0], sizes = [2, 8], strides = [1, 1]} : vector<16x8xf32> to vector<2x8xf32>
    %367 = vector.shape_cast %366 : vector<2x8xf32> to vector<2x1x8xf32>
    %368 = vector.extract_strided_slice %365 {offsets = [2, 0], sizes = [2, 8], strides = [1, 1]} : vector<16x8xf32> to vector<2x8xf32>
    %369 = vector.shape_cast %368 : vector<2x8xf32> to vector<2x1x8xf32>
    %370 = vector.extract_strided_slice %365 {offsets = [4, 0], sizes = [2, 8], strides = [1, 1]} : vector<16x8xf32> to vector<2x8xf32>
    %371 = vector.shape_cast %370 : vector<2x8xf32> to vector<2x1x8xf32>
    %372 = vector.extract_strided_slice %365 {offsets = [6, 0], sizes = [2, 8], strides = [1, 1]} : vector<16x8xf32> to vector<2x8xf32>
    %373 = vector.shape_cast %372 : vector<2x8xf32> to vector<2x1x8xf32>
    %374 = vector.extract_strided_slice %365 {offsets = [8, 0], sizes = [2, 8], strides = [1, 1]} : vector<16x8xf32> to vector<2x8xf32>
    %375 = vector.shape_cast %374 : vector<2x8xf32> to vector<2x1x8xf32>
    %376 = vector.extract_strided_slice %365 {offsets = [10, 0], sizes = [2, 8], strides = [1, 1]} : vector<16x8xf32> to vector<2x8xf32>
    %377 = vector.shape_cast %376 : vector<2x8xf32> to vector<2x1x8xf32>
    %378 = vector.extract_strided_slice %365 {offsets = [12, 0], sizes = [2, 8], strides = [1, 1]} : vector<16x8xf32> to vector<2x8xf32>
    %379 = vector.shape_cast %378 : vector<2x8xf32> to vector<2x1x8xf32>
    %380 = vector.extract_strided_slice %365 {offsets = [14, 0], sizes = [2, 8], strides = [1, 1]} : vector<16x8xf32> to vector<2x8xf32>
    %381 = vector.shape_cast %380 : vector<2x8xf32> to vector<2x1x8xf32>
    %382 = tpu.concatenate %367, %369, %371, %373, %375, %377, %379, %381 in 1 : vector<2x1x8xf32>, vector<2x1x8xf32>, vector<2x1x8xf32>, vector<2x1x8xf32>, vector<2x1x8xf32>, vector<2x1x8xf32>, vector<2x1x8xf32>, vector<2x1x8xf32> -> vector<2x8x8xf32>
    %c0_81 = arith.constant 0 : index
    %c0_82 = arith.constant 0 : index
    %c0_83 = arith.constant 0 : index
    %383 = vector.load %arg3[%c0_81, %c0_82, %c0_83] : memref<2x8x8xf32, #tpu.memory_space<vmem>>, vector<2x8x8xf32>
    tpu.vector_store %arg3[%c0_81, %c0_82, %c0_83], %382 {strides = array<i32>} : memref<2x8x8xf32, #tpu.memory_space<vmem>>, vector<2x8x8xf32>,
    return
  }
}

</mosaic_0001>

<bundles_post_ra>
// kernel: forward.1
= control target key start
LH: loop header
LB: loop body
LE: loop exit
PB: predicated region body
PF: predicated region fallthrough
CT: control target
= control target key end

     0   :  { %8 = vsyncpa [#allocation4], 0  ;;  %s2038_s0 = inlined_call_operand.hbm [shape: f32[2,8,16], index: 0, kind: input, shape index: {}]   ;;  %s2039_s1 = inlined_call_operand.hbm [shape: bf16[144,128], index: 1, kind: input, shape index: {}]   ;;  %s2040_s2 = inlined_call_operand.hbm [shape: f32[3,128], index: 2, kind: input, shape index: {}]   ;;  %s2041_s3 = inlined_call_operand.hbm [shape: f32[2,8,8], index: 3, kind: output, shape index: {}]  }
   0x1   :  { %9 = vsyncpa [#allocation7], 0  ;;  %s28_s14 = sshll.u32 %s2039_s1, 4  ;;  %s29_s14 = int_to_ptr.hbm [resolvable:$true] %s28_s14 }
   0x2   :  { %10 = vsyncpa [#allocation5], 0  ;;  %s1762_s15 = smov [#allocation6]   ;;  %s15_s19 = sshll.u32 %s2038_s0, 4  ;;  %s16_s19 = int_to_ptr.hbm [resolvable:$true] %s15_s19 }
   0x3   :  { %s30_s16 = sshll.u32 %s1762_s15, 4  ;;  %s1763_s20 = smov 64   ;;  %s31_s16 = int_to_ptr.vmem [resolvable:$true] %s30_s16 }
   0x4   :  { %s1764_s21 = smov 4   ;;  %s1765_s22 = smov [#allocation3]  }
   0x5   :  { %36 = dma.hbm_to_vmem [thread:$0]  %s29_s14, 1152, %s31_s16, [#allocation7], %s1763_s20, %s1763_s20, %s1764_s21  }
   0x6   :  { %s17_s23 = sshll.u32 %s1765_s22, 4  ;;  %s1766_s24 = smov 128   ;;  %s18_s23 = int_to_ptr.vmem [resolvable:$true] %s17_s23 }
   0x7   :  { %s1767_s1 = smov 8   ;;  %s42_s27 = sshll.u32 %s2040_s2, 4  ;;  %s43_s27 = int_to_ptr.hbm [resolvable:$true] %s42_s27 }
   0x8   :  { %23 = dma.hbm_to_vmem [thread:$0]  %s16_s19, 256, %s18_s23, [#allocation4], %s1766_s24, %s1766_s24, %s1767_s1  }
   0x9   :  { %s1768_s0 = smov [#allocation8]  }
   0xa   :  { %s44_s28 = sshll.u32 %s1768_s0, 4  ;;  %s45_s28 = int_to_ptr.vmem [resolvable:$true] %s44_s28 }
   0xb   :  { %47 = dma.hbm_to_vmem [thread:$0]  %s43_s27, 64, %s45_s28, [#allocation7]  }
   0xc   :  { %1756 = dma.done.wait [#allocation4], 256  }
   0xd   :  { %1757 = vsyncadd [#allocation4], 4294967040 }
   0xe   :  { %1758 = dma.done.wait [#allocation7], 1216  }
   0xf   :  { %1759 = vsyncadd [#allocation7], 4294966080  ;;  %vm66_vm0 = vcmask 1041409   ;;  %vm71_vm1 = vcmask 1043459   ;;  %v1512_v0 = vld [vmem:[#allocation6 + $0x10] sm:$0xff]  ;;  %v1510_v1 = vld [vmem:[#allocation6] sm:$0xff] }
  0x10   :  { %vm76_vm2 = vcmask 1045509   ;;  %vm81_vm3 = vcmask 1047559   ;;  %vm99_vm4 = vcmask 1041408   ;;  %vm101_vm5 = vcmask 1043456   ;;  %v61_v2 = vld [vmem:[#allocation3] sm:$0xff]  ;;  %v62_v3 = vld [vmem:[#allocation3 + $0x8] sm:$0xff]  ;;  %163 = vmatpush.bf16.msra.mxu1 %v1512_v0  ;;  %134 = vmatpush.bf16.msra.mxu0 %v1510_v1 }
  0x11   :  { %vm103_vm6 = vcmask 1045504   ;;  %v1511_v4 = vld [vmem:[#allocation6 + $0x8] sm:$0xff]  ;;  %v65_v5 = vrot.slane %v62_v3, 7  ;;  %v69_v6 = vrot.slane %v61_v2, 7  ;;  %v70_v7 = vrot.slane %v62_v3, 6  ;;  %227 = vmatpush.bf16.msra.mxu2 %v1512_v0  ;;  %298 = vmatpush.bf16.msra.mxu3 %v1512_v0  ;;  %s1770_s2 = smov 32  }
  0x12   :  { %v74_v8 = vrot.slane %v61_v2, 6  ;;  %v75_v9 = vrot.slane %v62_v3, 5  ;;  %v79_v10 = vrot.slane %v61_v2, 5  ;;  %v80_v11 = vrot.slane %v62_v3, 4  ;;  %v1821_v36 = vld [vmem:[#allocation8] ss:$0 sm:$0xff] }
  0x13   :  { %v84_v12 = vrot.slane %v61_v2, 4  ;;  %v67_v13 = vsel %vm66_vm0, %v65_v5, %v61_v2  ;;  %v72_v14 = vsel %vm71_vm1, %v70_v7, %v69_v6  ;;  %v85_v15 = vrot.slane %v62_v3, 3  ;;  %s1771_s29 = smov [#allocation9]   ;;  %s1427_s6 = sshll.u32 %s2041_s3, 4  ;;  %s1428_s6 = int_to_ptr.hbm [resolvable:$true] %s1427_s6 }
  0x14   :  { %v88_v16 = vrot.slane %v61_v2, 3  ;;  %369 = vmatpush.bf16.msrb.mxu0 %v1512_v0  ;;  %v77_v17 = vsel %vm76_vm2, %v75_v9, %v74_v8  ;;  %v82_v18 = vsel %vm81_vm3, %v80_v11, %v79_v10  ;;  %v89_v19 = vrot.slane %v62_v3, 2  ;;  %164 = vmatpush.bf16.msra.mxu1 %v1511_v4  ;;  %s1425_s30 = sshll.u32 %s1771_s29, 4  ;;  %s1426_s30 = int_to_ptr.vmem [resolvable:$true] %s1425_s30 }
  0x15   :  { %v92_v20 = vrot.slane %v61_v2, 2  ;;  %v86_v21 = vsel %vm66_vm0, %v85_v15, %v84_v12  ;;  %v93_v22 = vrot.slane %v62_v3, 1  ;;  %v96_v23 = vrot.slane %v61_v2, 1  ;;  %228 = vmatpush.bf16.msra.mxu2 %v1511_v4  ;;  %299 = vmatpush.bf16.msra.mxu3 %v1511_v4 }
  0x16   :  { %v100_v24 = vsel %vm99_vm4, %v67_v13, %v72_v14  ;;  %v90_v25 = vsel %vm71_vm1, %v89_v19, %v88_v16  ;;  %v1769_v32 = vmov 0   ;;  %vm123_vm7 = vcmask 130048  }
  0x17   :  { %v102_v26 = vsel %vm101_vm5, %v100_v24, %v77_v17  ;;  %v94_v27 = vsel %vm76_vm2, %v93_v22, %v92_v20  ;;  %v97_v28 = vsel %vm81_vm3, %v62_v3, %v96_v23  ;;  %v105_v30 = vsel %vm99_vm4, %v86_v21, %v90_v25  ;;  %165 = vmatmul.bf16.vlgmr.msra.gmra.mxu1 %v1769_v32 }
  0x18   :  { %v104_v29 = vsel %vm103_vm6, %v102_v26, %v82_v18  ;;  %370 = vmatpush.bf16.msrb.mxu0 %v1511_v4  ;;  %v106_v31 = vsel %vm101_vm5, %v105_v30, %v94_v27  ;;  %440 = vmatpush.bf16.msrb.mxu1 %v1512_v0  ;;  %vm153_vm12 = vcmask 261120  }
  0x19   :  { %506 = vmatpush.bf16.msrb.mxu2 %v1512_v0  ;;  %v107_v33 = vsel %vm103_vm6, %v106_v31, %v97_v28  ;;  %576 = vmatpush.bf16.msrb.mxu3 %v1512_v0 }
  0x1a   :  { %v115_v34 = vpack.c.bf16 %v107_v33, %v104_v29 }
  0x1c   :  { %1445 = vmatmul.msk.bf16.vlgmr.msra.gmra.mxu0 %vm123_vm7, %v115_v34  ;;  %441 = vmatpush.bf16.msrb.mxu1 %v1511_v4 }
  0x1d   :  { %507 = vmatpush.bf16.msrb.mxu2 %v1511_v4  ;;  %577 = vmatpush.bf16.msrb.mxu3 %v1511_v4 }
  0x1e   :  { %646 = vmatpush.bf16.msra.mxu0 %v1512_v0 }
  0x22   :  { %647 = vmatpush.bf16.msra.mxu0 %v1511_v4 }
  0x94   :  { %v166_v35 = vpop.f32.mrf.mxu1 }
  0x99   :  { %v136_v37 = vpop.f32.mrf.mxu0 }
  0x9a   :  { %v1824_v38 = vadd.f32 %v1821_v36, %v136_v37 }
  0x9c   :  { %v170_v39 = vadd.f32 %v166_v35, %v1824_v38  ;;  %v168_v40 = vpop.f32.mrf.mxu1 }
  0x9e   :  { %1532 = vtanh.f32 %v170_v39  ;;  %v1454_v42 = vmul.f32 -1.442695, %v170_v39 }
  0xa0   :  { %1534 = vpow2.f32 %v1454_v42 }
  0xa4   :  { %v1533_v41 = vpop.eup %1532 }
  0xa5   :  { %193 = vrot.lane.b32.xlu0 %v1533_v41, %s1763_s20 }
  0xa6   :  { %v1535_v43 = vpop.eup %1534 }
  0xa7   :  { %v174_v44 = vadd.f32 1.0, %v1535_v43 }
  0xa9   :  { %1536 = vrcp.f32 %v174_v44  ;;  %v186_v50 = vand.u32 2147483648, %v174_v44  ;;  %vm180_vm9 = vweird.f32 %v174_v44  ;;  %v184_v51 = vand.u32 2147483647, %v174_v44 }
  0xab   :  { %v187_v53 = vor.u32 1.1754944e-38, %v186_v50  ;;  %vm185_vm11 = vcmp.eq.f32.partialorder %v184_v51, 8.507059e+37 }
  0xaf   :  { %v1537_v45 = vpop.eup %1536 }
  0xb0   :  { %v176_v46 = vmul.f32 %v1537_v45, %v174_v44  ;;  %vm181_vm8 = vweird.f32 %v1537_v45 }
  0xb1   :  { %vm182_vm10 = vmor %vm180_vm9, %vm181_vm8 }
  0xb2   :  { %v177_v47 = vsub.f32 1.0, %v176_v46 }
  0xb4   :  { %v178_v48 = vmul.f32 %v1537_v45, %v177_v47 }
  0xb6   :  { %v179_v49 = vadd.f32 %v1537_v45, %v178_v48 }
  0xb8   :  { %v183_v52 = vsel %vm182_vm10, %v1537_v45, %v179_v49 }
  0xb9   :  { %v188_v55 = vsel %vm185_vm11, %v187_v53, %v183_v52 }
  0xba   :  { %v191_v57 = vmul.f32 0.0, %v188_v55 }
 0x117   :  { %v194_v54 = vpop.permute.xlu0 %193 }
 0x118   :  { %v196_v56 = vmul.f32 %v194_v54, %v188_v55 }
 0x11a   :  { %198 = vrot.lane.b32.xlu0 %v196_v56, %s1770_s2 }
 0x18c   :  { %v199_v58 = vpop.permute.xlu0 %198 }
 0x18d   :  { %v201_v59 = vadd.f32 %v199_v58, %v191_v57 }
 0x18f   :  { %1538 = vtanh.f32 %v201_v59  ;;  %v259_v21 = vrot.slane %v201_v59, 6 }
 0x195   :  { %v1539_v60 = vpop.eup %1538 }
 0x196   :  { %204 = vrot.lane.b32.xlu1 %v1539_v60, %s1763_s20 }
 0x208   :  { %v205_v61 = vpop.permute.xlu1 %204 }
 0x209   :  { %v1830_v62 = vmul.f32 %v205_v61, %v188_v55 }
 0x20b   :  { %v214_v63 = vpack.c.bf16 %v1830_v62, %v1830_v62 }
 0x20d   :  { %216 = vrot.lane.b32.xlu1 %v214_v63, %s1770_s2 }
 0x27f   :  { %v217_v0 = vpop.permute.xlu1 %216 }
 0x280   :  { %1455 = vmatmul.msk.bf16.vlgmr.msra.gmra.mxu2 %vm153_vm12, %v217_v0 }
 0x303   :  { %v230_v1 = vpop.f32.mrf.mxu2 }
 0x304   :  { %v235_v2 = vrot.slane %v230_v1, 6  ;;  %v138_v1 = vpop.f32.mrf.mxu0 }
 0x306   :  { %v237_v3 = vadd.f32 %v235_v2, %v1824_v38 }
 0x308   :  { %1540 = vtanh.f32 %v237_v3  ;;  %v1456_v6 = vmul.f32 -1.442695, %v237_v3 }
 0x30a   :  { %1542 = vpow2.f32 %v1456_v6 }
 0x30b   :  { %v232_v4 = vpop.f32.mrf.mxu2 }
 0x30e   :  { %v1541_v5 = vpop.eup %1540 }
 0x30f   :  { %263 = vrot.lane.b32.xlu2 %v1541_v5, %s1763_s20 }
 0x310   :  { %v1543_v7 = vpop.eup %1542 }
 0x311   :  { %v241_v8 = vadd.f32 1.0, %v1543_v7 }
 0x313   :  { %1544 = vrcp.f32 %v241_v8  ;;  %v253_v14 = vand.u32 2147483648, %v241_v8  ;;  %vm247_vm14 = vweird.f32 %v241_v8  ;;  %v251_v15 = vand.u32 2147483647, %v241_v8 }
 0x315   :  { %v254_v17 = vor.u32 1.1754944e-38, %v253_v14  ;;  %vm252_vm0 = vcmp.eq.f32.partialorder %v251_v15, 8.507059e+37 }
 0x319   :  { %v1545_v9 = vpop.eup %1544 }
 0x31a   :  { %v243_v10 = vmul.f32 %v1545_v9, %v241_v8  ;;  %vm248_vm13 = vweird.f32 %v1545_v9 }
 0x31b   :  { %vm249_vm15 = vmor %vm247_vm14, %vm248_vm13 }
 0x31c   :  { %v244_v11 = vsub.f32 1.0, %v243_v10 }
 0x31e   :  { %v245_v12 = vmul.f32 %v1545_v9, %v244_v11 }
 0x320   :  { %v246_v13 = vadd.f32 %v1545_v9, %v245_v12 }
 0x322   :  { %v250_v16 = vsel %vm249_vm15, %v1545_v9, %v246_v13 }
 0x323   :  { %v255_v19 = vsel %vm252_vm0, %v254_v17, %v250_v16 }
 0x324   :  { %v261_v22 = vmul.f32 %v259_v21, %v255_v19 }
 0x369   :  { %v264_v18 = vpop.permute.xlu2 %263 }
 0x36a   :  { %v266_v20 = vmul.f32 %v264_v18, %v255_v19 }
 0x36c   :  { %268 = vrot.lane.b32.xlu2 %v266_v20, %s1770_s2 }
 0x3c6   :  { %v269_v23 = vpop.permute.xlu2 %268 }
 0x3c7   :  { %v271_v24 = vadd.f32 %v269_v23, %v261_v22 }
 0x3c9   :  { %1546 = vtanh.f32 %v271_v24  ;;  %v330_v54 = vrot.slane %v271_v24, 6 }
 0x3cf   :  { %v1547_v25 = vpop.eup %1546 }
 0x3d0   :  { %274 = vrot.lane.b32.xlu0 %v1547_v25, %s1763_s20 }
 0x442   :  { %v275_v26 = vpop.permute.xlu0 %274 }
 0x443   :  { %v1840_v27 = vmul.f32 %v275_v26, %v255_v19 }
 0x445   :  { %v284_v28 = vpack.c.bf16 %v1840_v27, %v1840_v27 }
 0x447   :  { %v286_v29 = vrot.slane %v284_v28, 1 }
 0x449   :  { %287 = vrot.lane.b32.xlu1 %v286_v29, %s1770_s2 }
 0x4bb   :  { %v288_v30 = vpop.permute.xlu1 %287 }
 0x4bc   :  { %1457 = vmatmul.msk.bf16.vlgmr.msra.gmra.mxu3 %vm153_vm12, %v288_v30 }
 0x53f   :  { %v301_v31 = vpop.f32.mrf.mxu3 }
 0x540   :  { %v306_v33 = vrot.slane %v301_v31, 4 }
 0x542   :  { %v308_v34 = vadd.f32 %v306_v33, %v1824_v38  ;;  %v1867_v33 = vadd.f32 %v1821_v36, %v138_v1 }
 0x544   :  { %1548 = vtanh.f32 %v308_v34  ;;  %v1458_v39 = vmul.f32 -1.442695, %v308_v34 }
 0x546   :  { %1550 = vpow2.f32 %v1458_v39 }
 0x547   :  { %v303_v35 = vpop.f32.mrf.mxu3 }
 0x54a   :  { %v1549_v37 = vpop.eup %1548 }
 0x54b   :  { %334 = vrot.lane.b32.xlu2 %v1549_v37, %s1763_s20 }
 0x54c   :  { %v1551_v40 = vpop.eup %1550 }
 0x54d   :  { %v312_v41 = vadd.f32 1.0, %v1551_v40 }
 0x54f   :  { %1552 = vrcp.f32 %v312_v41  ;;  %v324_v47 = vand.u32 2147483648, %v312_v41  ;;  %vm318_vm2 = vweird.f32 %v312_v41  ;;  %v322_v48 = vand.u32 2147483647, %v312_v41 }
 0x551   :  { %v325_v50 = vor.u32 1.1754944e-38, %v324_v47  ;;  %vm323_vm7 = vcmp.eq.f32.partialorder %v322_v48, 8.507059e+37 }
 0x555   :  { %v1553_v42 = vpop.eup %1552 }
 0x556   :  { %v314_v43 = vmul.f32 %v1553_v42, %v312_v41  ;;  %vm319_vm1 = vweird.f32 %v1553_v42 }
 0x557   :  { %vm320_vm3 = vmor %vm318_vm2, %vm319_vm1 }
 0x558   :  { %v315_v44 = vsub.f32 1.0, %v314_v43 }
 0x55a   :  { %v316_v45 = vmul.f32 %v1553_v42, %v315_v44 }
 0x55c   :  { %v317_v46 = vadd.f32 %v1553_v42, %v316_v45 }
 0x55e   :  { %v321_v49 = vsel %vm320_vm3, %v1553_v42, %v317_v46 }
 0x55f   :  { %v326_v52 = vsel %vm323_vm7, %v325_v50, %v321_v49 }
 0x560   :  { %v332_v55 = vmul.f32 %v330_v54, %v326_v52 }
 0x5a5   :  { %v335_v51 = vpop.permute.xlu2 %334 }
 0x5a6   :  { %v337_v53 = vmul.f32 %v335_v51, %v326_v52 }
 0x5a8   :  { %339 = vrot.lane.b32.xlu0 %v337_v53, %s1770_s2 }
 0x61a   :  { %v340_v56 = vpop.permute.xlu0 %339 }
 0x61b   :  { %v342_v57 = vadd.f32 %v340_v56, %v332_v55 }
 0x61d   :  { %1554 = vtanh.f32 %v342_v57  ;;  %v401_v21 = vrot.slane %v342_v57, 6 }
 0x623   :  { %v1555_v58 = vpop.eup %1554 }
 0x624   :  { %345 = vrot.lane.b32.xlu1 %v1555_v58, %s1763_s20 }
 0x696   :  { %v346_v59 = vpop.permute.xlu1 %345 }
 0x697   :  { %v1850_v60 = vmul.f32 %v346_v59, %v326_v52 }
 0x699   :  { %v355_v61 = vpack.c.bf16 %v1850_v60, %v1850_v60 }
 0x69b   :  { %v357_v63 = vrot.slane %v355_v61, 2 }
 0x69d   :  { %358 = vrot.lane.b32.xlu2 %v357_v63, %s1770_s2 }
 0x6f7   :  { %v359_v0 = vpop.permute.xlu2 %358 }
 0x6f8   :  { %1459 = vmatmul.msk.bf16.vlgmr.msrb.gmra.mxu0 %vm153_vm12, %v359_v0 }
 0x775   :  { %v372_v2 = vpop.f32.mrf.mxu0 }
 0x776   :  { %v377_v3 = vrot.slane %v372_v2, 2 }
 0x778   :  { %v379_v4 = vadd.f32 %v377_v3, %v1824_v38 }
 0x77a   :  { %1556 = vtanh.f32 %v379_v4  ;;  %v1460_v7 = vmul.f32 -1.442695, %v379_v4 }
 0x77c   :  { %1558 = vpow2.f32 %v1460_v7 }
 0x77d   :  { %v374_v5 = vpop.f32.mrf.mxu0 }
 0x780   :  { %v1557_v6 = vpop.eup %1556 }
 0x781   :  { %405 = vrot.lane.b32.xlu0 %v1557_v6, %s1763_s20 }
 0x782   :  { %v1559_v8 = vpop.eup %1558 }
 0x783   :  { %v383_v9 = vadd.f32 1.0, %v1559_v8 }
 0x785   :  { %1560 = vrcp.f32 %v383_v9  ;;  %v395_v15 = vand.u32 2147483648, %v383_v9  ;;  %vm389_vm9 = vweird.f32 %v383_v9  ;;  %v393_v16 = vand.u32 2147483647, %v383_v9 }
 0x787   :  { %v396_v17 = vor.u32 1.1754944e-38, %v395_v15  ;;  %vm394_vm11 = vcmp.eq.f32.partialorder %v393_v16, 8.507059e+37 }
 0x78b   :  { %v1561_v10 = vpop.eup %1560 }
 0x78c   :  { %v385_v11 = vmul.f32 %v1561_v10, %v383_v9  ;;  %vm390_vm8 = vweird.f32 %v1561_v10 }
 0x78d   :  { %vm391_vm10 = vmor %vm389_vm9, %vm390_vm8 }
 0x78e   :  { %v386_v12 = vsub.f32 1.0, %v385_v11 }
 0x790   :  { %v387_v13 = vmul.f32 %v1561_v10, %v386_v12 }
 0x792   :  { %v388_v14 = vadd.f32 %v1561_v10, %v387_v13 }
 0x794   :  { %v392_v38 = vsel %vm391_vm10, %v1561_v10, %v388_v14 }
 0x795   :  { %v397_v19 = vsel %vm394_vm11, %v396_v17, %v392_v38 }
 0x796   :  { %v403_v22 = vmul.f32 %v401_v21, %v397_v19 }
 0x7f3   :  { %v406_v18 = vpop.permute.xlu0 %405 }
 0x7f4   :  { %v408_v20 = vmul.f32 %v406_v18, %v397_v19 }
 0x7f6   :  { %410 = vrot.lane.b32.xlu1 %v408_v20, %s1770_s2 }
 0x868   :  { %v411_v23 = vpop.permute.xlu1 %410 }
 0x869   :  { %v413_v24 = vadd.f32 %v411_v23, %v403_v22 }
 0x86b   :  { %1562 = vtanh.f32 %v413_v24  ;;  %v469_v54 = vrot.slane %v413_v24, 6 }
 0x871   :  { %v1563_v25 = vpop.eup %1562 }
 0x872   :  { %416 = vrot.lane.b32.xlu2 %v1563_v25, %s1763_s20 }
 0x8cc   :  { %v417_v26 = vpop.permute.xlu2 %416 }
 0x8cd   :  { %v1860_v28 = vmul.f32 %v417_v26, %v397_v19 }
 0x8cf   :  { %v426_v29 = vpack.c.bf16 %v1860_v28, %v1860_v28 }
 0x8d1   :  { %v428_v30 = vrot.slane %v426_v29, 3 }
 0x8d3   :  { %429 = vrot.lane.b32.xlu0 %v428_v30, %s1770_s2 }
 0x945   :  { %v430_v31 = vpop.permute.xlu0 %429 }
 0x946   :  { %1461 = vmatmul.msk.bf16.vlgmr.msrb.gmra.mxu1 %vm153_vm12, %v430_v31 }
 0x9c3   :  { %v443_v34 = vpop.f32.mrf.mxu1 }
 0x9c4   :  { %v447_v35 = vadd.f32 %v443_v34, %v1867_v33 }
 0x9c6   :  { %1564 = vtanh.f32 %v447_v35  ;;  %v1462_v40 = vmul.f32 -1.442695, %v447_v35 }
 0x9c8   :  { %1566 = vpow2.f32 %v1462_v40 }
 0x9cb   :  { %v445_v37 = vpop.f32.mrf.mxu1 }
 0x9cc   :  { %v1565_v39 = vpop.eup %1564 }
 0x9cd   :  { %473 = vrot.lane.b32.xlu1 %v1565_v39, %s1763_s20 }
 0x9ce   :  { %v1567_v41 = vpop.eup %1566 }
 0x9cf   :  { %v451_v42 = vadd.f32 1.0, %v1567_v41 }
 0x9d1   :  { %1568 = vrcp.f32 %v451_v42  ;;  %v463_v36 = vand.u32 2147483648, %v451_v42  ;;  %vm457_vm14 = vweird.f32 %v451_v42  ;;  %v461_v48 = vand.u32 2147483647, %v451_v42 }
 0x9d3   :  { %v464_v50 = vor.u32 1.1754944e-38, %v463_v36  ;;  %vm462_vm0 = vcmp.eq.f32.partialorder %v461_v48, 8.507059e+37 }
 0x9d7   :  { %v1569_v43 = vpop.eup %1568 }
 0x9d8   :  { %v453_v44 = vmul.f32 %v1569_v43, %v451_v42  ;;  %vm458_vm13 = vweird.f32 %v1569_v43 }
 0x9d9   :  { %vm459_vm15 = vmor %vm457_vm14, %vm458_vm13 }
 0x9da   :  { %v454_v45 = vsub.f32 1.0, %v453_v44 }
 0x9dc   :  { %v455_v46 = vmul.f32 %v1569_v43, %v454_v45 }
 0x9de   :  { %v456_v47 = vadd.f32 %v1569_v43, %v455_v46 }
 0x9e0   :  { %v460_v49 = vsel %vm459_vm15, %v1569_v43, %v456_v47 }
 0x9e1   :  { %v465_v52 = vsel %vm462_vm0, %v464_v50, %v460_v49 }
 0x9e2   :  { %v471_v55 = vmul.f32 %v469_v54, %v465_v52 }
 0xa3f   :  { %v474_v51 = vpop.permute.xlu1 %473 }
 0xa40   :  { %v476_v53 = vmul.f32 %v474_v51, %v465_v52 }
 0xa42   :  { %478 = vrot.lane.b32.xlu2 %v476_v53, %s1770_s2 }
 0xa9c   :  { %v479_v56 = vpop.permute.xlu2 %478 }
 0xa9d   :  { %v481_v57 = vadd.f32 %v479_v56, %v471_v55 }
 0xa9f   :  { %1570 = vtanh.f32 %v481_v57  ;;  %v538_v20 = vrot.slane %v481_v57, 6 }
 0xaa5   :  { %v1571_v58 = vpop.eup %1570 }
 0xaa6   :  { %484 = vrot.lane.b32.xlu0 %v1571_v58, %s1763_s20 }
 0xb18   :  { %v485_v59 = vpop.permute.xlu0 %484 }
 0xb19   :  { %v1873_v61 = vmul.f32 %v485_v59, %v465_v52 }
 0xb1b   :  { %v493_v63 = vpack.c.bf16 %v1873_v61, %v1873_v61 }
 0xb1d   :  { %495 = vrot.lane.b32.xlu1 %v493_v63, %s1770_s2 }
 0xb8f   :  { %v496_v0 = vpop.permute.xlu1 %495 }
 0xb90   :  { %1463 = vmatmul.msk.bf16.vlgmr.msrb.gmra.mxu2 %vm153_vm12, %v496_v0 }
 0xc13   :  { %v509_v1 = vpop.f32.mrf.mxu2 }
 0xc14   :  { %v514_v2 = vrot.slane %v509_v1, 6 }
 0xc16   :  { %v516_v3 = vadd.f32 %v514_v2, %v1867_v33 }
 0xc18   :  { %1572 = vtanh.f32 %v516_v3  ;;  %v1464_v6 = vmul.f32 -1.442695, %v516_v3 }
 0xc1a   :  { %1574 = vpow2.f32 %v1464_v6 }
 0xc1b   :  { %v511_v4 = vpop.f32.mrf.mxu2 }
 0xc1e   :  { %v1573_v5 = vpop.eup %1572 }
 0xc1f   :  { %542 = vrot.lane.b32.xlu2 %v1573_v5, %s1763_s20 }
 0xc20   :  { %v1575_v7 = vpop.eup %1574 }
 0xc21   :  { %v520_v8 = vadd.f32 1.0, %v1575_v7 }
 0xc23   :  { %1576 = vrcp.f32 %v520_v8  ;;  %v532_v14 = vand.u32 2147483648, %v520_v8  ;;  %vm526_vm2 = vweird.f32 %v520_v8  ;;  %v530_v15 = vand.u32 2147483647, %v520_v8 }
 0xc25   :  { %v533_v38 = vor.u32 1.1754944e-38, %v532_v14  ;;  %vm531_vm7 = vcmp.eq.f32.partialorder %v530_v15, 8.507059e+37 }
 0xc29   :  { %v1577_v9 = vpop.eup %1576 }
 0xc2a   :  { %v522_v10 = vmul.f32 %v1577_v9, %v520_v8  ;;  %vm527_vm1 = vweird.f32 %v1577_v9 }
 0xc2b   :  { %vm528_vm3 = vmor %vm526_vm2, %vm527_vm1  ;;  %vm212_vm1 = vcmask 254976   ;;  %vm424_vm2 = vcmask 261126  }
 0xc2c   :  { %v523_v11 = vsub.f32 1.0, %v522_v10 }
 0xc2e   :  { %v524_v12 = vmul.f32 %v1577_v9, %v523_v11 }
 0xc30   :  { %v525_v13 = vadd.f32 %v1577_v9, %v524_v12 }
 0xc32   :  { %v529_v16 = vsel %vm528_vm3, %v1577_v9, %v525_v13  ;;  %vm353_vm3 = vcmask 259076  }
 0xc33   :  { %v534_v18 = vsel %vm531_vm7, %v533_v38, %v529_v16  ;;  %vm282_vm7 = vcmask 257026  }
 0xc34   :  { %v540_v21 = vmul.f32 %v538_v20, %v534_v18 }
 0xc79   :  { %v543_v17 = vpop.permute.xlu2 %542 }
 0xc7a   :  { %v545_v19 = vmul.f32 %v543_v17, %v534_v18 }
 0xc7c   :  { %547 = vrot.lane.b32.xlu0 %v545_v19, %s1770_s2 }
 0xcee   :  { %v548_v22 = vpop.permute.xlu0 %547 }
 0xcef   :  { %v550_v23 = vadd.f32 %v548_v22, %v540_v21 }
 0xcf1   :  { %1578 = vtanh.f32 %v550_v23  ;;  %v608_v55 = vrot.slane %v550_v23, 6 }
 0xcf7   :  { %v1579_v24 = vpop.eup %1578 }
 0xcf8   :  { %553 = vrot.lane.b32.xlu1 %v1579_v24, %s1763_s20 }
 0xd6a   :  { %v554_v25 = vpop.permute.xlu1 %553 }
 0xd6b   :  { %v1883_v26 = vmul.f32 %v554_v25, %v534_v18 }
 0xd6d   :  { %v562_v29 = vpack.c.bf16 %v1883_v26, %v1883_v26 }
 0xd6f   :  { %v564_v30 = vrot.slane %v562_v29, 1 }
 0xd71   :  { %565 = vrot.lane.b32.xlu2 %v564_v30, %s1770_s2 }
 0xdcb   :  { %v566_v31 = vpop.permute.xlu2 %565 }
 0xdcc   :  { %1465 = vmatmul.msk.bf16.vlgmr.msrb.gmra.mxu3 %vm153_vm12, %v566_v31 }
 0xe4f   :  { %v579_v34 = vpop.f32.mrf.mxu3 }
 0xe50   :  { %v584_v35 = vrot.slane %v579_v34, 4  ;;  %v1514_v34 = vld [vmem:[#allocation6 + $0x20] sm:$0xff] }
 0xe51   :  { %736 = vmatpush.bf16.msra.mxu1 %v1514_v34 }
 0xe52   :  { %v586_v37 = vadd.f32 %v584_v35, %v1867_v33  ;;  %v1515_v35 = vld [vmem:[#allocation6 + $0x28] sm:$0xff] }
 0xe54   :  { %1580 = vtanh.f32 %v586_v37  ;;  %v1466_v41 = vmul.f32 -1.442695, %v586_v37 }
 0xe56   :  { %1582 = vpow2.f32 %v1466_v41 }
 0xe57   :  { %v581_v39 = vpop.f32.mrf.mxu3 }
 0xe5a   :  { %v1581_v40 = vpop.eup %1580 }
 0xe5b   :  { %612 = vrot.lane.b32.xlu0 %v1581_v40, %s1763_s20  ;;  %v1513_v40 = vld [vmem:[#allocation6 + $0x18] sm:$0xff] }
 0xe5c   :  { %v1583_v42 = vpop.eup %1582  ;;  %737 = vmatpush.bf16.msra.mxu1 %v1513_v40 }
 0xe5d   :  { %v590_v43 = vadd.f32 1.0, %v1583_v42 }
 0xe5f   :  { %1584 = vrcp.f32 %v590_v43  ;;  %v602_v48 = vand.u32 2147483648, %v590_v43  ;;  %vm596_vm9 = vweird.f32 %v590_v43  ;;  %v600_v49 = vand.u32 2147483647, %v590_v43 }
 0xe61   :  { %v603_v51 = vor.u32 1.1754944e-38, %v602_v48  ;;  %vm601_vm11 = vcmp.eq.f32.partialorder %v600_v49, 8.507059e+37 }
 0xe65   :  { %v1585_v44 = vpop.eup %1584 }
 0xe66   :  { %v592_v45 = vmul.f32 %v1585_v44, %v590_v43  ;;  %vm597_vm8 = vweird.f32 %v1585_v44 }
 0xe67   :  { %vm598_vm10 = vmor %vm596_vm9, %vm597_vm8 }
 0xe68   :  { %v593_v46 = vsub.f32 1.0, %v592_v45 }
 0xe6a   :  { %v594_v47 = vmul.f32 %v1585_v44, %v593_v46  ;;  %v1923_v46 = vld [vmem:[#allocation8 + $0x1] ss:$0 sm:$0xff] }
 0xe6c   :  { %v595_v36 = vadd.f32 %v1585_v44, %v594_v47 }
 0xe6e   :  { %v599_v50 = vsel %vm598_vm10, %v1585_v44, %v595_v36 }
 0xe6f   :  { %v604_v53 = vsel %vm601_vm11, %v603_v51, %v599_v50 }
 0xe70   :  { %v610_v56 = vmul.f32 %v608_v55, %v604_v53 }
 0xecd   :  { %v613_v52 = vpop.permute.xlu0 %612 }
 0xece   :  { %v615_v54 = vmul.f32 %v613_v52, %v604_v53 }
 0xed0   :  { %617 = vrot.lane.b32.xlu1 %v615_v54, %s1770_s2 }
 0xf42   :  { %v618_v57 = vpop.permute.xlu1 %617 }
 0xf43   :  { %v620_v58 = vadd.f32 %v618_v57, %v610_v56 }
 0xf45   :  { %1586 = vtanh.f32 %v620_v58  ;;  %v678_v23 = vrot.slane %v620_v58, 6 }
 0xf4b   :  { %v1587_v59 = vpop.eup %1586 }
 0xf4c   :  { %623 = vrot.lane.b32.xlu2 %v1587_v59, %s1763_s20 }
 0xfa6   :  { %v624_v63 = vpop.permute.xlu2 %623 }
 0xfa7   :  { %v626_v0 = vmul.f32 %v624_v63, %v604_v53 }
 0xfa9   :  { %v632_v1 = vpack.c.bf16 %v626_v0, %v626_v0 }
 0xfab   :  { %v634_v2 = vrot.slane %v632_v1, 2 }
 0xfad   :  { %635 = vrot.lane.b32.xlu0 %v634_v2, %s1770_s2 }
0x101f   :  { %v636_v3 = vpop.permute.xlu0 %635 }
0x1020   :  { %1467 = vmatmul.msk.bf16.vlgmr.msra.gmra.mxu0 %vm153_vm12, %v636_v3 }
0x109d   :  { %v649_v4 = vpop.f32.mrf.mxu0 }
0x109e   :  { %v654_v5 = vrot.slane %v649_v4, 2 }
0x10a0   :  { %v656_v6 = vadd.f32 %v654_v5, %v1867_v33 }
0x10a2   :  { %1588 = vtanh.f32 %v656_v6  ;;  %v1468_v9 = vmul.f32 -1.442695, %v656_v6 }
0x10a4   :  { %1590 = vpow2.f32 %v1468_v9 }
0x10a5   :  { %v651_v7 = vpop.f32.mrf.mxu0 }
0x10a8   :  { %v1589_v8 = vpop.eup %1588 }
0x10a9   :  { %682 = vrot.lane.b32.xlu1 %v1589_v8, %s1763_s20 }
0x10aa   :  { %v1591_v10 = vpop.eup %1590 }
0x10ab   :  { %v660_v11 = vadd.f32 1.0, %v1591_v10 }
0x10ad   :  { %1592 = vrcp.f32 %v660_v11  ;;  %v672_v16 = vand.u32 2147483648, %v660_v11  ;;  %vm666_vm14 = vweird.f32 %v660_v11  ;;  %v670_v38 = vand.u32 2147483647, %v660_v11 }
0x10af   :  { %v673_v17 = vor.u32 1.1754944e-38, %v672_v16  ;;  %vm671_vm0 = vcmp.eq.f32.partialorder %v670_v38, 8.507059e+37 }
0x10b1   :  { %209 = vrot.lane.b32.xlu1 %v1830_v62, %s1770_s2 }
0x10b3   :  { %v1593_v12 = vpop.eup %1592 }
0x10b4   :  { %v662_v33 = vmul.f32 %v1593_v12, %v660_v11  ;;  %vm667_vm13 = vweird.f32 %v1593_v12 }
0x10b5   :  { %vm668_vm15 = vmor %vm666_vm14, %vm667_vm13 }
0x10b6   :  { %v663_v13 = vsub.f32 1.0, %v662_v33 }
0x10b8   :  { %v664_v14 = vmul.f32 %v1593_v12, %v663_v13 }
0x10b9   :  { %421 = vrot.lane.b32.xlu1 %v1860_v28, %s1770_s2 }
0x10ba   :  { %v665_v15 = vadd.f32 %v1593_v12, %v664_v14 }
0x10bc   :  { %v669_v62 = vsel %vm668_vm15, %v1593_v12, %v665_v15 }
0x10bd   :  { %v674_v18 = vsel %vm671_vm0, %v673_v17, %v669_v62 }
0x10be   :  { %v680_v24 = vmul.f32 %v678_v23, %v674_v18 }
0x10c1   :  { %628 = vrot.lane.b32.xlu1 %v626_v0, %s1770_s2 }
0x111b   :  { %v683_v28 = vpop.permute.xlu1 %682 }
0x111c   :  { %v685_v19 = vmul.f32 %v683_v28, %v674_v18 }
0x111e   :  { %687 = vrot.lane.b32.xlu2 %v685_v19, %s1770_s2 }
0x1123   :  { %v210_v20 = vpop.permute.xlu1 %209 }
0x1124   :  { %213 = vst.msk [vmem:[#allocation2] sm:$0x3] %vm212_vm1, %v210_v20 }
0x1126   :  { %279 = vrot.lane.b32.xlu2 %v1840_v27, %s1770_s2 }
0x112b   :  { %v422_v21 = vpop.permute.xlu1 %421 }
0x112c   :  { %425 = vst.msk [vmem:[#allocation2] sm:$0xc0] %vm424_vm2, %v422_v21 }
0x112e   :  { %489 = vrot.lane.b32.xlu2 %v1873_v61, %s1770_s2  ;;  %v1516_v61 = vld [vmem:[#allocation6 + $0x30] sm:$0xff] }
0x112f   :  { %762 = vmatpush.bf16.msra.mxu2 %v1516_v61  ;;  %825 = vmatpush.bf16.msra.mxu3 %v1516_v61 }
0x1130   :  { %895 = vmatpush.bf16.msrb.mxu0 %v1516_v61  ;;  %965 = vmatpush.bf16.msrb.mxu1 %v1516_v61 }
0x1133   :  { %v629_v22 = vpop.permute.xlu1 %628  ;;  %763 = vmatpush.bf16.msra.mxu2 %v1515_v35  ;;  %826 = vmatpush.bf16.msra.mxu3 %v1515_v35 }
0x1134   :  { %631 = vst.msk [vmem:[#allocation2 + $0x8] sm:$0x30] %vm353_vm3, %v629_v22  ;;  %896 = vmatpush.bf16.msrb.mxu0 %v1515_v35  ;;  %966 = vmatpush.bf16.msrb.mxu1 %v1515_v35 }
0x1136   :  { %764 = vmatmul.bf16.vlgmr.msra.gmra.mxu2 %v1769_v32 }
0x1137   :  { %1035 = vmatpush.bf16.msrb.mxu2 %v1516_v61  ;;  %1101 = vmatpush.bf16.msrb.mxu3 %v1516_v61 }
0x1138   :  { %1171 = vmatpush.bf16.msra.mxu0 %v1516_v61 }
0x113b   :  { %1036 = vmatpush.bf16.msrb.mxu2 %v1515_v35  ;;  %1102 = vmatpush.bf16.msrb.mxu3 %v1515_v35 }
0x113c   :  { %1172 = vmatpush.bf16.msra.mxu0 %v1515_v35 }
0x1178   :  { %v688_v25 = vpop.permute.xlu2 %687 }
0x1179   :  { %v690_v29 = vadd.f32 %v688_v25, %v680_v24 }
0x117b   :  { %1594 = vtanh.f32 %v690_v29 }
0x1180   :  { %v280_v30 = vpop.permute.xlu2 %279 }
0x1181   :  { %v1595_v31 = vpop.eup %1594  ;;  %283 = vst.msk [vmem:[#allocation2] sm:$0xc] %vm282_vm7, %v280_v30 }
0x1182   :  { %693 = vrot.lane.b32.xlu0 %v1595_v31, %s1763_s20 }
0x1188   :  { %v490_v27 = vpop.permute.xlu2 %489 }
0x1189   :  { %492 = vst.msk [vmem:[#allocation2 + $0x8] sm:$0x3] %vm212_vm1, %v490_v27 }
0x118a   :  { %350 = vrot.lane.b32.xlu0 %v1850_v60, %s1770_s2 }
0x1192   :  { %558 = vrot.lane.b32.xlu0 %v1883_v26, %s1770_s2 }
0x11b9   :  { %v765_v44 = vpop.f32.mrf.mxu2 }
0x11c1   :  { %v767_v45 = vpop.f32.mrf.mxu2 }
0x11f4   :  { %v694_v60 = vpop.permute.xlu0 %693 }
0x11f5   :  { %v696_v26 = vmul.f32 %v694_v60, %v674_v18 }
0x11f7   :  { %698 = vrot.lane.b32.xlu2 %v696_v26, %s1770_s2 }
0x11fc   :  { %v351_v37 = vpop.permute.xlu0 %350 }
0x11fd   :  { %354 = vst.msk [vmem:[#allocation2] sm:$0x30] %vm353_vm3, %v351_v37 }
0x1204   :  { %v559_v39 = vpop.permute.xlu0 %558  ;;  %v702_v32 = vld [vmem:[#allocation2] sm:$0xff] }
0x1205   :  { %561 = vst.msk [vmem:[#allocation2 + $0x8] sm:$0xc] %vm282_vm7, %v559_v39 }
0x1251   :  { %v699_v41 = vpop.permute.xlu2 %698 }
0x1252   :  { %701 = vst.msk [vmem:[#allocation2 + $0x8] sm:$0xc0] %vm424_vm2, %v699_v41 }
0x1259   :  { %v703_v42 = vld [vmem:[#allocation2 + $0x8] sm:$0xff] }
0x125a   :  { %v713_v43 = vpack.c.bf16 %v703_v42, %v702_v32 }
0x125c   :  { %1477 = vmatmul.msk.bf16.vlgmr.msra.gmra.mxu1 %vm153_vm12, %v713_v43 }
0x125d   :  { %1241 = vmatpush.bf16.msra.mxu1 %v1516_v61 }
0x1261   :  { %1242 = vmatpush.bf16.msra.mxu1 %v1515_v35 }
0x12d9   :  { %v739_v47 = vpop.f32.mrf.mxu1 }
0x12da   :  { %v1926_v36 = vadd.f32 %v1923_v46, %v739_v47 }
0x12dc   :  { %v769_v48 = vadd.f32 %v765_v44, %v1926_v36 }
0x12de   :  { %1596 = vtanh.f32 %v769_v48  ;;  %v1486_v50 = vmul.f32 -1.442695, %v769_v48 }
0x12e0   :  { %1598 = vpow2.f32 %v1486_v50 }
0x12e4   :  { %v1597_v49 = vpop.eup %1596 }
0x12e5   :  { %792 = vrot.lane.b32.xlu0 %v1597_v49, %s1763_s20 }
0x12e6   :  { %v1599_v51 = vpop.eup %1598 }
0x12e7   :  { %v773_v52 = vadd.f32 1.0, %v1599_v51 }
0x12e9   :  { %1600 = vrcp.f32 %v773_v52  ;;  %v785_v58 = vand.u32 2147483648, %v773_v52  ;;  %vm779_vm9 = vweird.f32 %v773_v52  ;;  %v783_v59 = vand.u32 2147483647, %v773_v52 }
0x12eb   :  { %v786_v0 = vor.u32 1.1754944e-38, %v785_v58  ;;  %vm784_vm11 = vcmp.eq.f32.partialorder %v783_v59, 8.507059e+37 }
0x12ef   :  { %v1601_v53 = vpop.eup %1600 }
0x12f0   :  { %v775_v54 = vmul.f32 %v1601_v53, %v773_v52  ;;  %vm780_vm8 = vweird.f32 %v1601_v53 }
0x12f1   :  { %vm781_vm10 = vmor %vm779_vm9, %vm780_vm8 }
0x12f2   :  { %v776_v55 = vsub.f32 1.0, %v775_v54 }
0x12f4   :  { %v777_v56 = vmul.f32 %v1601_v53, %v776_v55 }
0x12f6   :  { %v778_v57 = vadd.f32 %v1601_v53, %v777_v56 }
0x12f8   :  { %v782_v63 = vsel %vm781_vm10, %v1601_v53, %v778_v57 }
0x12f9   :  { %v787_v2 = vsel %vm784_vm11, %v786_v0, %v782_v63 }
0x12fa   :  { %v790_v4 = vmul.f32 0.0, %v787_v2 }
0x1357   :  { %v793_v1 = vpop.permute.xlu0 %792 }
0x1358   :  { %v795_v3 = vmul.f32 %v793_v1, %v787_v2 }
0x135a   :  { %797 = vrot.lane.b32.xlu1 %v795_v3, %s1770_s2 }
0x13cc   :  { %v798_v5 = vpop.permute.xlu1 %797 }
0x13cd   :  { %v800_v6 = vadd.f32 %v798_v5, %v790_v4 }
0x13cf   :  { %1602 = vtanh.f32 %v800_v6  ;;  %v857_v31 = vrot.slane %v800_v6, 6 }
0x13d5   :  { %v1603_v7 = vpop.eup %1602 }
0x13d6   :  { %803 = vrot.lane.b32.xlu2 %v1603_v7, %s1763_s20 }
0x1430   :  { %v804_v8 = vpop.permute.xlu2 %803 }
0x1431   :  { %v1932_v9 = vmul.f32 %v804_v8, %v787_v2 }
0x1433   :  { %v812_v10 = vpack.c.bf16 %v1932_v9, %v1932_v9 }
0x1435   :  { %814 = vrot.lane.b32.xlu0 %v812_v10, %s1770_s2 }
0x14a7   :  { %v815_v11 = vpop.permute.xlu0 %814 }
0x14a8   :  { %1487 = vmatmul.msk.bf16.vlgmr.msra.gmra.mxu3 %vm153_vm12, %v815_v11  ;;  %v741_v11 = vpop.f32.mrf.mxu1 }
0x152b   :  { %v828_v12 = vpop.f32.mrf.mxu3 }
0x152c   :  { %v833_v33 = vrot.slane %v828_v12, 6 }
0x152e   :  { %v835_v13 = vadd.f32 %v833_v33, %v1926_v36 }
0x1530   :  { %1604 = vtanh.f32 %v835_v13  ;;  %v1488_v16 = vmul.f32 -1.442695, %v835_v13 }
0x1532   :  { %1606 = vpow2.f32 %v1488_v16 }
0x1533   :  { %v830_v14 = vpop.f32.mrf.mxu3 }
0x1536   :  { %v1605_v15 = vpop.eup %1604 }
0x1537   :  { %861 = vrot.lane.b32.xlu1 %v1605_v15, %s1763_s20 }
0x1538   :  { %v1607_v38 = vpop.eup %1606 }
0x1539   :  { %v839_v62 = vadd.f32 1.0, %v1607_v38 }
0x153b   :  { %1608 = vrcp.f32 %v839_v62  ;;  %v851_v21 = vand.u32 2147483648, %v839_v62  ;;  %vm845_vm14 = vweird.f32 %v839_v62  ;;  %v849_v22 = vand.u32 2147483647, %v839_v62 }
0x153d   :  { %v852_v24 = vor.u32 1.1754944e-38, %v851_v21  ;;  %vm850_vm0 = vcmp.eq.f32.partialorder %v849_v22, 8.507059e+37 }
0x1541   :  { %v1609_v17 = vpop.eup %1608 }
0x1542   :  { %v841_v28 = vmul.f32 %v1609_v17, %v839_v62  ;;  %vm846_vm13 = vweird.f32 %v1609_v17 }
0x1543   :  { %vm847_vm15 = vmor %vm845_vm14, %vm846_vm13 }
0x1544   :  { %v842_v18 = vsub.f32 1.0, %v841_v28 }
0x1546   :  { %v843_v19 = vmul.f32 %v1609_v17, %v842_v18 }
0x1548   :  { %v844_v20 = vadd.f32 %v1609_v17, %v843_v19 }
0x154a   :  { %v848_v23 = vsel %vm847_vm15, %v1609_v17, %v844_v20 }
0x154b   :  { %v853_v29 = vsel %vm850_vm0, %v852_v24, %v848_v23 }
0x154c   :  { %v859_v27 = vmul.f32 %v857_v31, %v853_v29 }
0x15a9   :  { %v862_v25 = vpop.permute.xlu1 %861 }
0x15aa   :  { %v864_v30 = vmul.f32 %v862_v25, %v853_v29 }
0x15ac   :  { %866 = vrot.lane.b32.xlu2 %v864_v30, %s1770_s2 }
0x1606   :  { %v867_v61 = vpop.permute.xlu2 %866 }
0x1607   :  { %v869_v34 = vadd.f32 %v867_v61, %v859_v27 }
0x1609   :  { %1610 = vtanh.f32 %v869_v34  ;;  %v927_v0 = vrot.slane %v869_v34, 6 }
0x160f   :  { %v1611_v35 = vpop.eup %1610 }
0x1610   :  { %872 = vrot.lane.b32.xlu0 %v1611_v35, %s1763_s20 }
0x1682   :  { %v873_v60 = vpop.permute.xlu0 %872 }
0x1683   :  { %v1942_v26 = vmul.f32 %v873_v60, %v853_v29 }
0x1685   :  { %v881_v37 = vpack.c.bf16 %v1942_v26, %v1942_v26 }
0x1687   :  { %v883_v39 = vrot.slane %v881_v37, 1 }
0x1689   :  { %884 = vrot.lane.b32.xlu1 %v883_v39, %s1770_s2 }
0x16fb   :  { %v885_v40 = vpop.permute.xlu1 %884 }
0x16fc   :  { %1489 = vmatmul.msk.bf16.vlgmr.msrb.gmra.mxu0 %vm153_vm12, %v885_v40 }
0x1779   :  { %v898_v41 = vpop.f32.mrf.mxu0 }
0x177a   :  { %v903_v32 = vrot.slane %v898_v41, 4  ;;  %v1969_v41 = vadd.f32 %v1923_v46, %v741_v11 }
0x177c   :  { %v905_v42 = vadd.f32 %v903_v32, %v1926_v36 }
0x177e   :  { %1612 = vtanh.f32 %v905_v42  ;;  %v1490_v45 = vmul.f32 -1.442695, %v905_v42 }
0x1780   :  { %1614 = vpow2.f32 %v1490_v45 }
0x1781   :  { %v900_v43 = vpop.f32.mrf.mxu0 }
0x1784   :  { %v1613_v44 = vpop.eup %1612 }
0x1785   :  { %931 = vrot.lane.b32.xlu2 %v1613_v44, %s1763_s20 }
0x1786   :  { %v1615_v47 = vpop.eup %1614 }
0x1787   :  { %v909_v48 = vadd.f32 1.0, %v1615_v47 }
0x1789   :  { %1616 = vrcp.f32 %v909_v48  ;;  %v921_v54 = vand.u32 2147483648, %v909_v48  ;;  %vm915_vm9 = vweird.f32 %v909_v48  ;;  %v919_v55 = vand.u32 2147483647, %v909_v48 }
0x178b   :  { %v922_v57 = vor.u32 1.1754944e-38, %v921_v54  ;;  %vm920_vm11 = vcmp.eq.f32.partialorder %v919_v55, 8.507059e+37 }
0x178f   :  { %v1617_v49 = vpop.eup %1616 }
0x1790   :  { %v911_v50 = vmul.f32 %v1617_v49, %v909_v48  ;;  %vm916_vm8 = vweird.f32 %v1617_v49 }
0x1791   :  { %vm917_vm10 = vmor %vm915_vm9, %vm916_vm8 }
0x1792   :  { %v912_v51 = vsub.f32 1.0, %v911_v50 }
0x1794   :  { %v913_v52 = vmul.f32 %v1617_v49, %v912_v51 }
0x1796   :  { %v914_v53 = vadd.f32 %v1617_v49, %v913_v52 }
0x1798   :  { %v918_v56 = vsel %vm917_vm10, %v1617_v49, %v914_v53 }
0x1799   :  { %v923_v59 = vsel %vm920_vm11, %v922_v57, %v918_v56 }
0x179a   :  { %v929_v1 = vmul.f32 %v927_v0, %v923_v59 }
0x17df   :  { %v932_v58 = vpop.permute.xlu2 %931 }
0x17e0   :  { %v934_v63 = vmul.f32 %v932_v58, %v923_v59 }
0x17e2   :  { %936 = vrot.lane.b32.xlu0 %v934_v63, %s1770_s2 }
0x1854   :  { %v937_v2 = vpop.permute.xlu0 %936 }
0x1855   :  { %v939_v3 = vadd.f32 %v937_v2, %v929_v1 }
0x1857   :  { %1618 = vtanh.f32 %v939_v3  ;;  %v997_v30 = vrot.slane %v939_v3, 6 }
0x185d   :  { %v1619_v4 = vpop.eup %1618 }
0x185e   :  { %942 = vrot.lane.b32.xlu1 %v1619_v4, %s1763_s20 }
0x18d0   :  { %v943_v5 = vpop.permute.xlu1 %942 }
0x18d1   :  { %v1952_v6 = vmul.f32 %v943_v5, %v923_v59 }
0x18d3   :  { %v951_v7 = vpack.c.bf16 %v1952_v6, %v1952_v6 }
0x18d5   :  { %v953_v8 = vrot.slane %v951_v7, 2 }
0x18d7   :  { %954 = vrot.lane.b32.xlu2 %v953_v8, %s1770_s2 }
0x1931   :  { %v955_v10 = vpop.permute.xlu2 %954 }
0x1932   :  { %1491 = vmatmul.msk.bf16.vlgmr.msrb.gmra.mxu1 %vm153_vm12, %v955_v10 }
0x19af   :  { %v968_v12 = vpop.f32.mrf.mxu1 }
0x19b0   :  { %v973_v33 = vrot.slane %v968_v12, 2 }
0x19b2   :  { %v975_v13 = vadd.f32 %v973_v33, %v1926_v36 }
0x19b4   :  { %1620 = vtanh.f32 %v975_v13  ;;  %v1492_v16 = vmul.f32 -1.442695, %v975_v13 }
0x19b6   :  { %1622 = vpow2.f32 %v1492_v16 }
0x19b7   :  { %v970_v14 = vpop.f32.mrf.mxu1 }
0x19ba   :  { %v1621_v15 = vpop.eup %1620 }
0x19bb   :  { %1001 = vrot.lane.b32.xlu0 %v1621_v15, %s1763_s20 }
0x19bc   :  { %v1623_v38 = vpop.eup %1622 }
0x19bd   :  { %v979_v62 = vadd.f32 1.0, %v1623_v38 }
0x19bf   :  { %1624 = vrcp.f32 %v979_v62  ;;  %v991_v21 = vand.u32 2147483648, %v979_v62  ;;  %vm985_vm14 = vweird.f32 %v979_v62  ;;  %v989_v22 = vand.u32 2147483647, %v979_v62 }
0x19c1   :  { %v992_v23 = vor.u32 1.1754944e-38, %v991_v21  ;;  %vm990_vm0 = vcmp.eq.f32.partialorder %v989_v22, 8.507059e+37 }
0x19c5   :  { %v1625_v17 = vpop.eup %1624 }
0x19c6   :  { %v981_v28 = vmul.f32 %v1625_v17, %v979_v62  ;;  %vm986_vm13 = vweird.f32 %v1625_v17 }
0x19c7   :  { %vm987_vm15 = vmor %vm985_vm14, %vm986_vm13 }
0x19c8   :  { %v982_v18 = vsub.f32 1.0, %v981_v28 }
0x19ca   :  { %v983_v19 = vmul.f32 %v1625_v17, %v982_v18 }
0x19cc   :  { %v984_v20 = vadd.f32 %v1625_v17, %v983_v19 }
0x19ce   :  { %v988_v36 = vsel %vm987_vm15, %v1625_v17, %v984_v20 }
0x19cf   :  { %v993_v25 = vsel %vm990_vm0, %v992_v23, %v988_v36 }
0x19d0   :  { %v999_v31 = vmul.f32 %v997_v30, %v993_v25 }
0x1a2d   :  { %v1002_v24 = vpop.permute.xlu0 %1001 }
0x1a2e   :  { %v1004_v29 = vmul.f32 %v1002_v24, %v993_v25 }
0x1a30   :  { %1006 = vrot.lane.b32.xlu1 %v1004_v29, %s1770_s2 }
0x1aa2   :  { %v1007_v27 = vpop.permute.xlu1 %1006 }
0x1aa3   :  { %v1009_v61 = vadd.f32 %v1007_v27, %v999_v31 }
0x1aa5   :  { %1626 = vtanh.f32 %v1009_v61  ;;  %v1064_v63 = vrot.slane %v1009_v61, 6 }
0x1aab   :  { %v1627_v34 = vpop.eup %1626 }
0x1aac   :  { %1012 = vrot.lane.b32.xlu2 %v1627_v34, %s1763_s20 }
0x1b06   :  { %v1013_v35 = vpop.permute.xlu2 %1012 }
0x1b07   :  { %v1962_v60 = vmul.f32 %v1013_v35, %v993_v25 }
0x1b09   :  { %v1021_v37 = vpack.c.bf16 %v1962_v60, %v1962_v60 }
0x1b0b   :  { %v1023_v39 = vrot.slane %v1021_v37, 3 }
0x1b0d   :  { %1024 = vrot.lane.b32.xlu0 %v1023_v39, %s1770_s2 }
0x1b7f   :  { %v1025_v40 = vpop.permute.xlu0 %1024 }
0x1b80   :  { %1493 = vmatmul.msk.bf16.vlgmr.msrb.gmra.mxu2 %vm153_vm12, %v1025_v40 }
0x1c03   :  { %v1038_v32 = vpop.f32.mrf.mxu2 }
0x1c04   :  { %v1042_v42 = vadd.f32 %v1038_v32, %v1969_v41 }
0x1c06   :  { %1628 = vtanh.f32 %v1042_v42  ;;  %v1494_v45 = vmul.f32 -1.442695, %v1042_v42 }
0x1c08   :  { %1630 = vpow2.f32 %v1494_v45 }
0x1c0b   :  { %v1040_v43 = vpop.f32.mrf.mxu2 }
0x1c0c   :  { %v1629_v44 = vpop.eup %1628 }
0x1c0d   :  { %1068 = vrot.lane.b32.xlu1 %v1629_v44, %s1763_s20 }
0x1c0e   :  { %v1631_v47 = vpop.eup %1630 }
0x1c0f   :  { %v1046_v48 = vadd.f32 1.0, %v1631_v47 }
0x1c11   :  { %1632 = vrcp.f32 %v1046_v48  ;;  %v1058_v46 = vand.u32 2147483648, %v1046_v48  ;;  %vm1052_vm9 = vweird.f32 %v1046_v48  ;;  %v1056_v54 = vand.u32 2147483647, %v1046_v48 }
0x1c13   :  { %v1059_v56 = vor.u32 1.1754944e-38, %v1058_v46  ;;  %vm1057_vm11 = vcmp.eq.f32.partialorder %v1056_v54, 8.507059e+37 }
0x1c17   :  { %v1633_v49 = vpop.eup %1632 }
0x1c18   :  { %v1048_v50 = vmul.f32 %v1633_v49, %v1046_v48  ;;  %vm1053_vm8 = vweird.f32 %v1633_v49 }
0x1c19   :  { %vm1054_vm10 = vmor %vm1052_vm9, %vm1053_vm8 }
0x1c1a   :  { %v1049_v51 = vsub.f32 1.0, %v1048_v50 }
0x1c1c   :  { %v1050_v52 = vmul.f32 %v1633_v49, %v1049_v51 }
0x1c1e   :  { %v1051_v53 = vadd.f32 %v1633_v49, %v1050_v52 }
0x1c20   :  { %v1055_v55 = vsel %vm1054_vm10, %v1633_v49, %v1051_v53 }
0x1c21   :  { %v1060_v58 = vsel %vm1057_vm11, %v1059_v56, %v1055_v55 }
0x1c22   :  { %v1066_v0 = vmul.f32 %v1064_v63, %v1060_v58 }
0x1c7f   :  { %v1069_v57 = vpop.permute.xlu1 %1068 }
0x1c80   :  { %v1071_v59 = vmul.f32 %v1069_v57, %v1060_v58 }
0x1c82   :  { %1073 = vrot.lane.b32.xlu2 %v1071_v59, %s1770_s2 }
0x1cdc   :  { %v1074_v1 = vpop.permute.xlu2 %1073 }
0x1cdd   :  { %v1076_v2 = vadd.f32 %v1074_v1, %v1066_v0 }
0x1cdf   :  { %1634 = vtanh.f32 %v1076_v2  ;;  %v1133_v25 = vrot.slane %v1076_v2, 6 }
0x1ce5   :  { %v1635_v3 = vpop.eup %1634 }
0x1ce6   :  { %1079 = vrot.lane.b32.xlu0 %v1635_v3, %s1763_s20 }
0x1d58   :  { %v1080_v4 = vpop.permute.xlu0 %1079 }
0x1d59   :  { %v1975_v5 = vmul.f32 %v1080_v4, %v1060_v58 }
0x1d5b   :  { %v1088_v7 = vpack.c.bf16 %v1975_v5, %v1975_v5 }
0x1d5d   :  { %1090 = vrot.lane.b32.xlu1 %v1088_v7, %s1770_s2 }
0x1dcf   :  { %v1091_v8 = vpop.permute.xlu1 %1090 }
0x1dd0   :  { %1495 = vmatmul.msk.bf16.vlgmr.msrb.gmra.mxu3 %vm153_vm12, %v1091_v8 }
0x1e53   :  { %v1104_v10 = vpop.f32.mrf.mxu3 }
0x1e54   :  { %v1109_v11 = vrot.slane %v1104_v10, 6 }
0x1e56   :  { %v1111_v12 = vadd.f32 %v1109_v11, %v1969_v41 }
0x1e58   :  { %1636 = vtanh.f32 %v1111_v12  ;;  %v1496_v14 = vmul.f32 -1.442695, %v1111_v12 }
0x1e5a   :  { %1638 = vpow2.f32 %v1496_v14 }
0x1e5b   :  { %v1106_v33 = vpop.f32.mrf.mxu3 }
0x1e5e   :  { %v1637_v13 = vpop.eup %1636 }
0x1e5f   :  { %1137 = vrot.lane.b32.xlu2 %v1637_v13, %s1763_s20 }
0x1e60   :  { %v1639_v15 = vpop.eup %1638 }
0x1e61   :  { %v1115_v16 = vadd.f32 1.0, %v1639_v15 }
0x1e63   :  { %1640 = vrcp.f32 %v1115_v16  ;;  %v1127_v19 = vand.u32 2147483648, %v1115_v16  ;;  %vm1121_vm14 = vweird.f32 %v1115_v16  ;;  %v1125_v20 = vand.u32 2147483647, %v1115_v16 }
0x1e65   :  { %v1128_v22 = vor.u32 1.1754944e-38, %v1127_v19  ;;  %vm1126_vm0 = vcmp.eq.f32.partialorder %v1125_v20, 8.507059e+37 }
0x1e69   :  { %v1641_v38 = vpop.eup %1640 }
0x1e6a   :  { %v1117_v62 = vmul.f32 %v1641_v38, %v1115_v16  ;;  %vm1122_vm13 = vweird.f32 %v1641_v38 }
0x1e6b   :  { %vm1123_vm15 = vmor %vm1121_vm14, %vm1122_vm13 }
0x1e6c   :  { %v1118_v17 = vsub.f32 1.0, %v1117_v62 }
0x1e6e   :  { %v1119_v28 = vmul.f32 %v1641_v38, %v1118_v17 }
0x1e70   :  { %v1120_v18 = vadd.f32 %v1641_v38, %v1119_v28 }
0x1e72   :  { %v1124_v21 = vsel %vm1123_vm15, %v1641_v38, %v1120_v18 }
0x1e73   :  { %v1129_v23 = vsel %vm1126_vm0, %v1128_v22, %v1124_v21 }
0x1e74   :  { %v1135_v29 = vmul.f32 %v1133_v25, %v1129_v23 }
0x1eb9   :  { %v1138_v36 = vpop.permute.xlu2 %1137 }
0x1eba   :  { %v1140_v24 = vmul.f32 %v1138_v36, %v1129_v23 }
0x1ebc   :  { %1142 = vrot.lane.b32.xlu0 %v1140_v24, %s1770_s2 }
0x1f2e   :  { %v1143_v30 = vpop.permute.xlu0 %1142 }
0x1f2f   :  { %v1145_v31 = vadd.f32 %v1143_v30, %v1135_v29 }
0x1f31   :  { %1642 = vtanh.f32 %v1145_v31  ;;  %v1203_v63 = vrot.slane %v1145_v31, 6 }
0x1f37   :  { %v1643_v27 = vpop.eup %1642 }
0x1f38   :  { %1148 = vrot.lane.b32.xlu1 %v1643_v27, %s1763_s20 }
0x1faa   :  { %v1149_v61 = vpop.permute.xlu1 %1148 }
0x1fab   :  { %v1985_v34 = vmul.f32 %v1149_v61, %v1129_v23 }
0x1fad   :  { %v1157_v35 = vpack.c.bf16 %v1985_v34, %v1985_v34 }
0x1faf   :  { %v1159_v37 = vrot.slane %v1157_v35, 1 }
0x1fb1   :  { %1160 = vrot.lane.b32.xlu2 %v1159_v37, %s1770_s2 }
0x200b   :  { %v1161_v39 = vpop.permute.xlu2 %1160 }
0x200c   :  { %1497 = vmatmul.msk.bf16.vlgmr.msra.gmra.mxu0 %vm153_vm12, %v1161_v39 }
0x2089   :  { %v1174_v40 = vpop.f32.mrf.mxu0 }
0x208a   :  { %v1179_v32 = vrot.slane %v1174_v40, 4 }
0x208c   :  { %v1181_v42 = vadd.f32 %v1179_v32, %v1969_v41 }
0x208e   :  { %1644 = vtanh.f32 %v1181_v42  ;;  %v1498_v45 = vmul.f32 -1.442695, %v1181_v42 }
0x2090   :  { %1646 = vpow2.f32 %v1498_v45 }
0x2091   :  { %v1176_v43 = vpop.f32.mrf.mxu0 }
0x2092   :  { %v1517_v43 = vld [vmem:[#allocation6 + $0x38] sm:$0xff] }
0x2094   :  { %v1645_v44 = vpop.eup %1644 }
0x2095   :  { %1207 = vrot.lane.b32.xlu0 %v1645_v44, %s1763_s20 }
0x2096   :  { %v1647_v47 = vpop.eup %1646 }
0x2097   :  { %v1185_v48 = vadd.f32 1.0, %v1647_v47 }
0x2099   :  { %1648 = vrcp.f32 %v1185_v48  ;;  %v1197_v46 = vand.u32 2147483648, %v1185_v48  ;;  %vm1191_vm9 = vweird.f32 %v1185_v48  ;;  %v1195_v54 = vand.u32 2147483647, %v1185_v48 }
0x209b   :  { %v1198_v56 = vor.u32 1.1754944e-38, %v1197_v46  ;;  %vm1196_vm11 = vcmp.eq.f32.partialorder %v1195_v54, 8.507059e+37 }
0x209f   :  { %v1649_v49 = vpop.eup %1648 }
0x20a0   :  { %v1187_v50 = vmul.f32 %v1649_v49, %v1185_v48  ;;  %vm1192_vm8 = vweird.f32 %v1649_v49 }
0x20a1   :  { %vm1193_vm10 = vmor %vm1191_vm9, %vm1192_vm8 }
0x20a2   :  { %v1188_v51 = vsub.f32 1.0, %v1187_v50 }
0x20a4   :  { %v1189_v52 = vmul.f32 %v1649_v49, %v1188_v51 }
0x20a6   :  { %v1190_v53 = vadd.f32 %v1649_v49, %v1189_v52 }
0x20a8   :  { %v1194_v55 = vsel %vm1193_vm10, %v1649_v49, %v1190_v53  ;;  %v1531_v49 = vld [vmem:[#allocation8 + $0x2] ss:$0 sm:$0xff] }
0x20a9   :  { %v1199_v58 = vsel %vm1196_vm11, %v1198_v56, %v1194_v55 }
0x20aa   :  { %v1205_v0 = vmul.f32 %v1203_v63, %v1199_v58 }
0x2107   :  { %v1208_v57 = vpop.permute.xlu0 %1207 }
0x2108   :  { %v1210_v59 = vmul.f32 %v1208_v57, %v1199_v58 }
0x210a   :  { %1212 = vrot.lane.b32.xlu1 %v1210_v59, %s1770_s2 }
0x217c   :  { %v1213_v1 = vpop.permute.xlu1 %1212 }
0x217d   :  { %v1215_v2 = vadd.f32 %v1213_v1, %v1205_v0 }
0x217f   :  { %1650 = vtanh.f32 %v1215_v2  ;;  %v1273_v30 = vrot.slane %v1215_v2, 6 }
0x2185   :  { %v1651_v3 = vpop.eup %1650 }
0x2186   :  { %1218 = vrot.lane.b32.xlu2 %v1651_v3, %s1763_s20 }
0x21e0   :  { %v1219_v4 = vpop.permute.xlu2 %1218 }
0x21e1   :  { %v1221_v7 = vmul.f32 %v1219_v4, %v1199_v58 }
0x21e3   :  { %v1227_v8 = vpack.c.bf16 %v1221_v7, %v1221_v7 }
0x21e5   :  { %v1229_v10 = vrot.slane %v1227_v8, 2 }
0x21e7   :  { %1230 = vrot.lane.b32.xlu0 %v1229_v10, %s1770_s2 }
0x2259   :  { %v1231_v11 = vpop.permute.xlu0 %1230 }
0x225a   :  { %1499 = vmatmul.msk.bf16.vlgmr.msra.gmra.mxu1 %vm153_vm12, %v1231_v11 }
0x22d7   :  { %v1244_v12 = vpop.f32.mrf.mxu1 }
0x22d8   :  { %v1249_v33 = vrot.slane %v1244_v12, 2 }
0x22da   :  { %v1251_v13 = vadd.f32 %v1249_v33, %v1969_v41 }
0x22dc   :  { %1652 = vtanh.f32 %v1251_v13  ;;  %v1500_v16 = vmul.f32 -1.442695, %v1251_v13 }
0x22de   :  { %1654 = vpow2.f32 %v1500_v16 }
0x22df   :  { %v1246_v14 = vpop.f32.mrf.mxu1 }
0x22e2   :  { %v1653_v15 = vpop.eup %1652 }
0x22e3   :  { %1277 = vrot.lane.b32.xlu1 %v1653_v15, %s1763_s20 }
0x22e4   :  { %v1655_v38 = vpop.eup %1654 }
0x22e5   :  { %v1255_v62 = vadd.f32 1.0, %v1655_v38 }
0x22e7   :  { %1656 = vrcp.f32 %v1255_v62  ;;  %v1267_v20 = vand.u32 2147483648, %v1255_v62  ;;  %vm1261_vm14 = vweird.f32 %v1255_v62  ;;  %v1265_v21 = vand.u32 2147483647, %v1255_v62 }
0x22e9   :  { %v1268_v22 = vor.u32 1.1754944e-38, %v1267_v20  ;;  %vm1266_vm0 = vcmp.eq.f32.partialorder %v1265_v21, 8.507059e+37 }
0x22eb   :  { %808 = vrot.lane.b32.xlu1 %v1932_v9, %s1770_s2 }
0x22ed   :  { %v1657_v17 = vpop.eup %1656 }
0x22ee   :  { %v1257_v41 = vmul.f32 %v1657_v17, %v1255_v62  ;;  %vm1262_vm13 = vweird.f32 %v1657_v17 }
0x22ef   :  { %vm1263_vm15 = vmor %vm1261_vm14, %vm1262_vm13 }
0x22f0   :  { %v1258_v28 = vsub.f32 1.0, %v1257_v41 }
0x22f2   :  { %v1259_v18 = vmul.f32 %v1657_v17, %v1258_v28 }
0x22f3   :  { %1017 = vrot.lane.b32.xlu1 %v1962_v60, %s1770_s2 }
0x22f4   :  { %v1260_v19 = vadd.f32 %v1657_v17, %v1259_v18 }
0x22f6   :  { %v1264_v9 = vsel %vm1263_vm15, %v1657_v17, %v1260_v19 }
0x22f7   :  { %v1269_v36 = vsel %vm1266_vm0, %v1268_v22, %v1264_v9 }
0x22f8   :  { %v1275_v31 = vmul.f32 %v1273_v30, %v1269_v36 }
0x22fb   :  { %1223 = vrot.lane.b32.xlu1 %v1221_v7, %s1770_s2 }
0x2355   :  { %v1278_v60 = vpop.permute.xlu1 %1277 }
0x2356   :  { %v1280_v23 = vmul.f32 %v1278_v60, %v1269_v36 }
0x2358   :  { %1282 = vrot.lane.b32.xlu2 %v1280_v23, %s1770_s2 }
0x235d   :  { %v809_v24 = vpop.permute.xlu1 %808 }
0x235e   :  { %811 = vst.msk [vmem:[#allocation2] sm:$0x3] %vm212_vm1, %v809_v24 }
0x2360   :  { %877 = vrot.lane.b32.xlu2 %v1942_v26, %s1770_s2 }
0x2365   :  { %v1018_v25 = vpop.permute.xlu1 %1017 }
0x2366   :  { %1020 = vst.msk [vmem:[#allocation2] sm:$0xc0] %vm424_vm2, %v1018_v25 }
0x2368   :  { %1084 = vrot.lane.b32.xlu2 %v1975_v5, %s1770_s2  ;;  %v1518_v5 = vld [vmem:[#allocation6 + $0x40] sm:$0xff] }
0x2369   :  { %1329 = vmatpush.bf16.msra.mxu2 %v1518_v5 }
0x236d   :  { %v1224_v29 = vpop.permute.xlu1 %1223  ;;  %1330 = vmatpush.bf16.msra.mxu2 %v1517_v43 }
0x236e   :  { %1226 = vst.msk [vmem:[#allocation2 + $0x8] sm:$0x30] %vm353_vm3, %v1224_v29 }
0x23b2   :  { %v1283_v27 = vpop.permute.xlu2 %1282 }
0x23b3   :  { %v1285_v61 = vadd.f32 %v1283_v27, %v1275_v31 }
0x23b5   :  { %1658 = vtanh.f32 %v1285_v61 }
0x23ba   :  { %v878_v35 = vpop.permute.xlu2 %877 }
0x23bb   :  { %v1659_v37 = vpop.eup %1658  ;;  %880 = vst.msk [vmem:[#allocation2] sm:$0xc] %vm282_vm7, %v878_v35 }
0x23bc   :  { %1288 = vrot.lane.b32.xlu0 %v1659_v37, %s1763_s20 }
0x23c2   :  { %v1085_v26 = vpop.permute.xlu2 %1084 }
0x23c3   :  { %1087 = vst.msk [vmem:[#allocation2 + $0x8] sm:$0x3] %vm212_vm1, %v1085_v26  ;;  %vm1405_vm1 = vcmask 1042432  }
0x23c4   :  { %947 = vrot.lane.b32.xlu0 %v1952_v6, %s1770_s2 }
0x23cc   :  { %1153 = vrot.lane.b32.xlu0 %v1985_v34, %s1770_s2 }
0x242e   :  { %v1289_v39 = vpop.permute.xlu0 %1288 }
0x242f   :  { %v1291_v40 = vmul.f32 %v1289_v39, %v1269_v36 }
0x2431   :  { %1293 = vrot.lane.b32.xlu2 %v1291_v40, %s1770_s2 }
0x2436   :  { %v948_v32 = vpop.permute.xlu0 %947 }
0x2437   :  { %950 = vst.msk [vmem:[#allocation2] sm:$0x30] %vm353_vm3, %v948_v32  ;;  %vm1418_vm3 = vcmask 64512  }
0x243e   :  { %v1154_v42 = vpop.permute.xlu0 %1153  ;;  %v1297_v6 = vld [vmem:[#allocation2] sm:$0xff] }
0x243f   :  { %1156 = vst.msk [vmem:[#allocation2 + $0x8] sm:$0xc] %vm282_vm7, %v1154_v42  ;;  %v1304_v34 = vmax.f32 %v1297_v6, 0.0 }
0x248b   :  { %v1294_v44 = vpop.permute.xlu2 %1293 }
0x248c   :  { %1296 = vst.msk [vmem:[#allocation2 + $0x8] sm:$0xc0] %vm424_vm2, %v1294_v44  ;;  %vm1410_vm2 = vcmask 1044480  }
0x2493   :  { %v1298_v45 = vld [vmem:[#allocation2 + $0x8] sm:$0xff] }
0x2494   :  { %v1305_v47 = vmax.f32 %v1298_v45, 0.0 }
0x2496   :  { %v1306_v48 = vpack.c.bf16 %v1305_v47, %v1304_v34 }
0x2498   :  { %1509 = vmatmul.msk.bf16.vlgmr.msra.gmra.mxu2 %vm153_vm12, %v1306_v48  ;;  %vm1400_vm12 = vcmask 1040384  }
0x251b   :  { %v1332_v50 = vpop.f32.mrf.mxu2 }
0x251c   :  { %v1333_v51 = vadd.f32 %v1531_v49, %v1332_v50 }
0x251e   :  { %1340 = vst [vmem:[#allocation1] sm:$0xff] %v1333_v51  ;;  %v1338_v8 = vrot.slane %v1333_v51, 1 }
0x2523   :  { %v1334_v55 = vpop.f32.mrf.mxu2 }
0x2524   :  { %v1335_v56 = vadd.f32 %v1531_v49, %v1334_v55 }
0x2525   :  { %v1342_v52 = vld [vmem:[#allocation1 + $0x2] ss:$9 sm:$0xff] }
0x2526   :  { %v1344_v53 = vld [vmem:[#allocation1 + $0x3] ss:$9 sm:$0xff]  ;;  %v1372_v0 = vperm.slane %v1342_v52, 0  ;;  %v1356_v12 = vrot.slane %v1335_v56, 1  ;;  %v1384_v41 = vperm.slane %v1335_v56, 0 }
0x2527   :  { %1345 = vst [vmem:[#allocation1] sm:$0xff] %v1333_v51  ;;  %v1373_v1 = vperm.slane %v1344_v53, 0 }
0x2528   :  { %v1401_v33 = vsel %vm1400_vm12, %v1333_v51, %v1372_v0  ;;  %v1385_v28 = vperm.slane %v1356_v12, 0 }
0x2529   :  { %v1402_v13 = vsel %vm1400_vm12, %v1338_v8, %v1373_v1 }
0x252e   :  { %v1347_v46 = vld [vmem:[#allocation1 + $0x4] ss:$9 sm:$0xff] }
0x252f   :  { %v1349_v54 = vld [vmem:[#allocation1 + $0x5] ss:$9 sm:$0xff]  ;;  %v1376_v2 = vperm.slane %v1347_v46, 0 }
0x2530   :  { %1350 = vst [vmem:[#allocation1] sm:$0xff] %v1333_v51  ;;  %v1377_v7 = vperm.slane %v1349_v54, 0 }
0x2531   :  { %v1403_v14 = vsel %vm99_vm4, %v1401_v33, %v1376_v2 }
0x2532   :  { %v1404_v15 = vsel %vm99_vm4, %v1402_v13, %v1377_v7  ;;  %vm1415_vm4 = vcmask 1046528  }
0x2537   :  { %v1352_v57 = vld [vmem:[#allocation1 + $0x6] ss:$9 sm:$0xff] }
0x2538   :  { %v1354_v58 = vld [vmem:[#allocation1 + $0x7] ss:$9 sm:$0xff]  ;;  %v1380_v10 = vperm.slane %v1352_v57, 0 }
0x2539   :  { %1357 = vst [vmem:[#allocation1] sm:$0xff] %v1335_v56  ;;  %v1381_v11 = vperm.slane %v1354_v58, 0 }
0x253a   :  { %v1406_v62 = vsel %vm1405_vm1, %v1403_v14, %v1380_v10 }
0x253b   :  { %v1407_v17 = vsel %vm1405_vm1, %v1404_v15, %v1381_v11  ;;  %v1408_v9 = vsel %vm101_vm5, %v1406_v62, %v1384_v41 }
0x253c   :  { %v1409_v22 = vsel %vm101_vm5, %v1407_v17, %v1385_v28 }
0x2540   :  { %v1359_v59 = vld [vmem:[#allocation1 + $0x2] ss:$9 sm:$0xff] }
0x2541   :  { %v1361_v63 = vld [vmem:[#allocation1 + $0x3] ss:$9 sm:$0xff]  ;;  %v1388_v16 = vperm.slane %v1359_v59, 0 }
0x2542   :  { %1362 = vst [vmem:[#allocation1] sm:$0xff] %v1335_v56  ;;  %v1389_v38 = vperm.slane %v1361_v63, 0 }
0x2543   :  { %v1411_v23 = vsel %vm1410_vm2, %v1408_v9, %v1388_v16 }
0x2544   :  { %v1412_v24 = vsel %vm1410_vm2, %v1409_v22, %v1389_v38 }
0x2549   :  { %v1364_v3 = vld [vmem:[#allocation1 + $0x4] ss:$9 sm:$0xff] }
0x254a   :  { %v1366_v4 = vld [vmem:[#allocation1 + $0x5] ss:$9 sm:$0xff]  ;;  %v1392_v18 = vperm.slane %v1364_v3, 0 }
0x254b   :  { %1367 = vst [vmem:[#allocation1] sm:$0xff] %v1335_v56  ;;  %v1393_v19 = vperm.slane %v1366_v4, 0 }
0x254c   :  { %v1413_v25 = vsel %vm103_vm6, %v1411_v23, %v1392_v18 }
0x254d   :  { %v1414_v29 = vsel %vm103_vm6, %v1412_v24, %v1393_v19 }
0x2552   :  { %v1369_v20 = vld [vmem:[#allocation1 + $0x6] ss:$9 sm:$0xff] }
0x2553   :  { %v1371_v21 = vld [vmem:[#allocation1 + $0x7] ss:$9 sm:$0xff]  ;;  %v1396_v60 = vperm.slane %v1369_v20, 0 }
0x2554   :  { %v1397_v36 = vperm.slane %v1371_v21, 0 }
0x2555   :  { %v1416_v30 = vsel %vm1415_vm4, %v1413_v25, %v1396_v60 }
0x2556   :  { %v1417_v31 = vsel %vm1415_vm4, %v1414_v29, %v1397_v36  ;;  %1419 = vst.msk [vmem:[#allocation9] sm:$0xff] %vm1418_vm3, %v1416_v30 }
0x2557   :  { %1420 = vst.msk [vmem:[#allocation9 + $0x8] sm:$0xff] %vm1418_vm3, %v1417_v31 }
0x2558   :  { %1433 = dma.vmem_to_hbm [thread:$0]  %s1426_s30, 256, %s1428_s6, [#allocation5], %s1766_s24, %s1766_s24, %s1767_s1  }
0x2559   :  { %1760 = dma.done.wait [#allocation5], 256  }
0x255a   :  { %1761 = vsyncadd [#allocation5], 4294967040 }
0x255b   :  { %1438 = vsyncpa [#allocation4], 1 }
0x255c   :  { %1439 = vsyncpa [#allocation7], 1 }
0x255d   :  { %1440 = vsyncpa [#allocation5], 1 }

</bundles_post_ra>
